<compile_context>
chip_gen: v5e
topology: v5e:2x2
jax: 0.10.0
libtpu: 0.0.40
codegen_flags: <defaults>
</compile_context>

<pallas_src>
import numpy as np
import jax
import jax.numpy as jnp
from jax.experimental import pallas as pl
from jax.experimental.pallas import tpu as pltpu

BN_EPS = 1e-5


# -----------------------------------------------------------------------------
# Fused Pallas kernel
# -----------------------------------------------------------------------------
def _relu_bn_wide(z, pool_ref, bcast_ref, gb_ref):
    """ReLU + BatchNorm2d (training-mode batch stats) in the wide layout.

    z        : (N, S*C) f32 conv output, columns ordered (spatial-major,
               channel-minor), rows = images.
    pool_ref : (S*C, C) f32 constant 0/1 spatial-pooling matrix.
    bcast_ref: (C, S*C) f32 constant 0/1 per-channel broadcast matrix (pool^T).
    gb_ref   : (2, C)  f32, row 0 = gamma, row 1 = beta.
    """
    y = jnp.maximum(z, 0.0)                                           # ReLU
    sc = pool_ref.shape[0]
    c = pool_ref.shape[1]
    s = sc // c
    inv_cnt = 1.0 / float(z.shape[0] * s)                             # N * OH*OW

    # Single fused reduction sweep over [y, y*y] (lane concat), then pool the
    # per-(spatial, channel) column sums down to per-channel sums via a tiny
    # constant matmul.
    colsum = jnp.sum(jnp.concatenate([y, y * y], axis=1),
                     axis=0, keepdims=True)                           # (1, 2*S*C)
    sums = jnp.dot(jnp.concatenate([colsum[:, :sc], colsum[:, sc:]], axis=0),
                   pool_ref[...], preferred_element_type=jnp.float32)  # (2, C)

    mean = sums[0:1] * inv_cnt                                        # (1, C)
    var = jnp.maximum(sums[1:2] * inv_cnt - mean * mean, 0.0)         # guard rounding
    scale = gb_ref[0:1] * jax.lax.rsqrt(var + BN_EPS)                 # EUP rsqrt
    shift = gb_ref[1:2] - mean * scale

    # Broadcast per-channel scale/shift back to the wide (1, S*C) layout with
    # one tiny constant matmul, then a single FMA pass over the activation.
    wide = jnp.dot(jnp.concatenate([scale, shift], axis=0), bcast_ref[...],
                   preferred_element_type=jnp.float32)                # (2, S*C)
    return y * wide[0:1] + wide[1:2]


def _conv_relu_bn(y_bf16, t_ref, pool_ref, bcast_ref, gb_ref):
    """One conv layer = one MXU matmul with the dense conv matrix + ReLU + BN."""
    z = jnp.dot(y_bf16, t_ref[...], preferred_element_type=jnp.float32)
    return _relu_bn_wide(z, pool_ref, bcast_ref, gb_ref).astype(jnp.bfloat16)


def zfinch_fused_kernel(x_ref,
                        t1_ref, pool1_ref, bcast1_ref, gb1_ref,
                        t2_ref, pool2_ref, bcast2_ref, gb2_ref,
                        t3_ref, pool3_ref, bcast3_ref, gb3_ref,
                        t4_ref, pool4_ref, bcast4_ref, gb4_ref,
                        wl_ref, bl_ref, out_ref):
    y = x_ref[...]                                                    # (N, 256) bf16
    y = _conv_relu_bn(y, t1_ref, pool1_ref, bcast1_ref, gb1_ref)      # (N, 64*8)
    y = _conv_relu_bn(y, t2_ref, pool2_ref, bcast2_ref, gb2_ref)      # (N, 16*16)
    y = _conv_relu_bn(y, t3_ref, pool3_ref, bcast3_ref, gb3_ref)      # (N, 4*32)
    y = _conv_relu_bn(y, t4_ref, pool4_ref, bcast4_ref, gb4_ref)      # (N, 64)

    # Head: AdaptiveAvgPool2d(1) is identity at 1x1 spatial; Linear(64 -> 10),
    # weight zero-padded to 128 output columns for a lane-dense store.
    out_ref[...] = (jnp.dot(y, wl_ref[...], preferred_element_type=jnp.float32)
                    + bl_ref[...])


# -----------------------------------------------------------------------------
# pallas_call wrapper (single invocation; resident set is O(N) and tiny)
# -----------------------------------------------------------------------------
def zfinch_pallas_call(n, args):
    vspec = pl.BlockSpec(memory_space=pltpu.MemorySpace.VMEM)
    # Size the scoped VMEM limit from the actual resident set (+ live
    # intermediates + headroom), capped below v7x's 64 MiB physical VMEM.
    resident = sum(int(np.prod(a.shape)) * a.dtype.itemsize for a in args)
    resident += n * 128 * 4          # padded output block
    resident += n * 8192             # rough bound on live intermediate activations
    vmem_limit = int(min(64 << 20, max(16 << 20, 4 * resident)))
    return pl.pallas_call(
        zfinch_fused_kernel,
        in_specs=[vspec] * len(args),
        out_specs=vspec,
        out_shape=jax.ShapeDtypeStruct((n, 128), jnp.float32),
        compiler_params=pltpu.CompilerParams(vmem_limit_bytes=vmem_limit),
    )


@jax.jit
def zfinch_forward(x_nchw, params):
    """x_nchw: (N, 1, 16, 16) f32 -> (N, 10) f32 logits."""
    n = x_nchw.shape[0]
    # Cin == 1: per-image row-major (h, w) flatten; pure metadata reshape.
    x = x_nchw.reshape(n, 16 * 16).astype(jnp.bfloat16)
    args = (x,
            params["t1"], params["pool1"], params["bcast1"], params["gb1"],
            params["t2"], params["pool2"], params["bcast2"], params["gb2"],
            params["t3"], params["pool3"], params["bcast3"], params["gb3"],
            params["t4"], params["pool4"], params["bcast4"], params["gb4"],
            params["wl"], params["bl"])
    out_padded = zfinch_pallas_call(n, args)(*args)
    return out_padded[:, :10]


# -----------------------------------------------------------------------------
# Parameters (batch-independent; built once on the host)
# -----------------------------------------------------------------------------
def _kaiming_normal(key, cout, cin, k, a=0.1):
    """kaiming_normal_(w, a=0.1): fan_in mode, leaky_relu gain (PyTorch)."""
    fan_in = cin * k * k
    std = ((2.0 / (1.0 + a * a)) ** 0.5) / (fan_in ** 0.5)
    return std * jax.random.normal(key, (cout, cin, k, k), jnp.float32)   # OIHW


def _conv_matrix(w_oihw, hin, win, stride, pad):
    """Dense (Hin*Win*Cin, OH*OW*Cout) matrix implementing the conv on a
    per-image activation flattened row-major as (h, w, c)."""
    cout, cin, kh, kw = w_oihw.shape
    oh = (hin + 2 * pad - kh) // stride + 1
    ow = (win + 2 * pad - kw) // stride + 1
    t = np.zeros((hin * win * cin, oh * ow * cout), np.float32)
    for oy in range(oh):
        for ox in range(ow):
            col0 = (oy * ow + ox) * cout
            for ki in range(kh):
                ih = oy * stride + ki - pad
                if not (0 <= ih < hin):
                    continue
                for kj in range(kw):
                    iw = ox * stride + kj - pad
                    if not (0 <= iw < win):
                        continue
                    for c in range(cin):
                        t[(ih * win + iw) * cin + c, col0:col0 + cout] += \
                            w_oihw[:, c, ki, kj]
    return t


def make_params(key):
    k1, k2, k3, k4, kwl, kbl = jax.random.split(key, 6)
    # (cin, cout, ksize, hin, stride, pad) per conv layer; 16 -> 8 -> 4 -> 2 -> 1.
    geoms = [(1, 8, 5, 16, 2, 2),
             (8, 16, 3, 8, 2, 1),
             (16, 32, 3, 4, 2, 1),
             (32, 64, 3, 2, 2, 1)]
    p = {}
    for i, (wkey, (cin, cout, ksz, hin, stride, pad)) in enumerate(
            zip((k1, k2, k3, k4), geoms), start=1):
        w = np.asarray(_kaiming_normal(wkey, cout, cin, ksz, a=0.1))
        t = _conv_matrix(w, hin, hin, stride, pad)
        p[f"t{i}"] = jnp.asarray(t, jnp.bfloat16)          # conv-as-matrix, bf16 MXU operand
        oh = (hin + 2 * pad - ksz) // stride + 1
        s = oh * oh
        pool = np.tile(np.eye(cout, dtype=np.float32), (s, 1))   # (S*C, C) 0/1
        p[f"pool{i}"] = jnp.asarray(pool)
        p[f"bcast{i}"] = jnp.asarray(pool.T.copy())               # (C, S*C) 0/1
        p[f"gb{i}"] = jnp.concatenate([jnp.ones((1, cout), jnp.float32),   # BN gamma
                                       jnp.zeros((1, cout), jnp.float32)], # BN beta
                                      axis=0)
        # Conv bias: zero-initialized in __init__ and absorbed by BN -> dropped.
    bound = 1.0 / (64.0 ** 0.5)                             # PyTorch Linear default init
    wl = jax.random.uniform(kwl, (64, 10), jnp.float32, -bound, bound)
    bl = jax.random.uniform(kbl, (10,), jnp.float32, -bound, bound)
    p["wl"] = jnp.zeros((64, 128), jnp.bfloat16).at[:, :10].set(wl.astype(jnp.bfloat16))
    p["bl"] = jnp.zeros((1, 128), jnp.float32).at[0, :10].set(bl)
    return p


if __name__ == "__main__":
    key = jax.random.PRNGKey(0)
    pkey, xkey = jax.random.split(key)
    N = 2
    params = make_params(pkey)
    # Single-channel 16x16 "spectrogram" input, batch = 2.
    x = jax.random.normal(xkey, (N, 1, 16, 16), dtype=jnp.float32)

    out = jax.block_until_ready(zfinch_forward(x, params))
    assert out.shape == (N, 10) and out.dtype == jnp.float32
    assert bool(jnp.all(jnp.isfinite(out)))
    # TODO(synk): .train() loop (Adam / OneCycleLR / CrossEntropy) is host-side
    # training code, not part of the forward pass -- not translated.
    print("KERNEL_OK")
</pallas_src>

<mosaic_0001>
module attributes {stable_mosaic.version = 11 : i64} {
  func.func @zfinch_fused_kernel(%arg0: memref<2x256xbf16, #tpu.memory_space<vmem>>, %arg1: memref<256x512xbf16, #tpu.memory_space<vmem>>, %arg2: memref<512x8xf32, #tpu.memory_space<vmem>>, %arg3: memref<8x512xf32, #tpu.memory_space<vmem>>, %arg4: memref<2x8xf32, #tpu.memory_space<vmem>>, %arg5: memref<512x256xbf16, #tpu.memory_space<vmem>>, %arg6: memref<256x16xf32, #tpu.memory_space<vmem>>, %arg7: memref<16x256xf32, #tpu.memory_space<vmem>>, %arg8: memref<2x16xf32, #tpu.memory_space<vmem>>, %arg9: memref<256x128xbf16, #tpu.memory_space<vmem>>, %arg10: memref<128x32xf32, #tpu.memory_space<vmem>>, %arg11: memref<32x128xf32, #tpu.memory_space<vmem>>, %arg12: memref<2x32xf32, #tpu.memory_space<vmem>>, %arg13: memref<128x64xbf16, #tpu.memory_space<vmem>>, %arg14: memref<64x64xf32, #tpu.memory_space<vmem>>, %arg15: memref<64x64xf32, #tpu.memory_space<vmem>>, %arg16: memref<2x64xf32, #tpu.memory_space<vmem>>, %arg17: memref<64x128xbf16, #tpu.memory_space<vmem>>, %arg18: memref<1x128xf32, #tpu.memory_space<vmem>>, %arg19: memref<2x128xf32, #tpu.memory_space<vmem>>) attributes {dimension_semantics = [], scalar_prefetch = 0 : i64, scratch_operands = 0 : i64, tpu.core_type = #tpu.core_type<tc>} {
    %c0 = arith.constant 0 : index
    %c0_0 = arith.constant 0 : index
    %0 = vector.load %arg0[%c0, %c0_0] : memref<2x256xbf16, #tpu.memory_space<vmem>>, vector<2x256xbf16>
    %c0_1 = arith.constant 0 : index
    %c0_2 = arith.constant 0 : index
    %1 = vector.load %arg1[%c0_1, %c0_2] : memref<256x512xbf16, #tpu.memory_space<vmem>>, vector<256x512xbf16>
    %cst = arith.constant dense<0.000000e+00> : vector<2x512xf32>
    %2 = tpu.matmul %0, %1, %cst {dimension_numbers = #tpu.dot_dimension_numbers<[1], [0], [0], [1], [0, 0, 1, 1], [], []>} : vector<2x256xbf16>, vector<256x512xbf16>, vector<2x512xf32> -> vector<2x512xf32>
    %cst_3 = arith.constant 0.000000e+00 : f32
    %3 = vector.broadcast %cst_3 : f32 to vector<2x512xf32>
    %4 = arith.maximumf %2, %3 : vector<2x512xf32>
    %5 = arith.mulf %4, %4 : vector<2x512xf32>
    %6 = tpu.concatenate %4, %5 in 1 : vector<2x512xf32>, vector<2x512xf32> -> vector<2x1024xf32>
    %cst_4 = arith.constant dense<0.000000e+00> : vector<1024xf32>
    %7 = vector.multi_reduction <add>, %6, %cst_4 [0] : vector<2x1024xf32> to vector<1024xf32>
    %8 = vector.shape_cast %7 : vector<1024xf32> to vector<1x1024xf32>
    %9 = vector.extract_strided_slice %8 {offsets = [0, 0], sizes = [1, 512], strides = [1, 1]} : vector<1x1024xf32> to vector<1x512xf32>
    %10 = vector.extract_strided_slice %8 {offsets = [0, 512], sizes = [1, 512], strides = [1, 1]} : vector<1x1024xf32> to vector<1x512xf32>
    %11 = tpu.concatenate %9, %10 in 0 : vector<1x512xf32>, vector<1x512xf32> -> vector<2x512xf32>
    %c0_5 = arith.constant 0 : index
    %c0_6 = arith.constant 0 : index
    %12 = vector.load %arg2[%c0_5, %c0_6] : memref<512x8xf32, #tpu.memory_space<vmem>>, vector<512x8xf32>
    %cst_7 = arith.constant dense<0.000000e+00> : vector<2x8xf32>
    %13 = tpu.matmul %11, %12, %cst_7 {dimension_numbers = #tpu.dot_dimension_numbers<[1], [0], [0], [1], [0, 0, 1, 1], [], []>} : vector<2x512xf32>, vector<512x8xf32>, vector<2x8xf32> -> vector<2x8xf32>
    %14 = vector.extract_strided_slice %13 {offsets = [0, 0], sizes = [1, 8], strides = [1, 1]} : vector<2x8xf32> to vector<1x8xf32>
    %cst_8 = arith.constant 7.812500e-03 : f32
    %15 = vector.broadcast %cst_8 : f32 to vector<1x8xf32>
    %16 = arith.mulf %14, %15 : vector<1x8xf32>
    %17 = vector.extract_strided_slice %13 {offsets = [1, 0], sizes = [1, 8], strides = [1, 1]} : vector<2x8xf32> to vector<1x8xf32>
    %cst_9 = arith.constant 7.812500e-03 : f32
    %18 = vector.broadcast %cst_9 : f32 to vector<1x8xf32>
    %19 = arith.mulf %17, %18 : vector<1x8xf32>
    %20 = arith.mulf %16, %16 : vector<1x8xf32>
    %21 = arith.subf %19, %20 : vector<1x8xf32>
    %cst_10 = arith.constant 0.000000e+00 : f32
    %22 = vector.broadcast %cst_10 : f32 to vector<1x8xf32>
    %23 = arith.maximumf %21, %22 : vector<1x8xf32>
    %c0_11 = arith.constant 0 : index
    %c0_12 = arith.constant 0 : index
    %24 = vector.load %arg4[%c0_11, %c0_12] : memref<2x8xf32, #tpu.memory_space<vmem>>, vector<1x8xf32>
    %cst_13 = arith.constant 9.99999974E-6 : f32
    %25 = vector.broadcast %cst_13 : f32 to vector<1x8xf32>
    %26 = arith.addf %23, %25 : vector<1x8xf32>
    %27 = math.rsqrt %26 : vector<1x8xf32>
    %28 = arith.mulf %24, %27 : vector<1x8xf32>
    %c1 = arith.constant 1 : index
    %c0_14 = arith.constant 0 : index
    %29 = vector.load %arg4[%c1, %c0_14] : memref<2x8xf32, #tpu.memory_space<vmem>>, vector<1x8xf32>
    %30 = arith.mulf %16, %28 : vector<1x8xf32>
    %31 = arith.subf %29, %30 : vector<1x8xf32>
    %32 = tpu.concatenate %28, %31 in 0 : vector<1x8xf32>, vector<1x8xf32> -> vector<2x8xf32>
    %c0_15 = arith.constant 0 : index
    %c0_16 = arith.constant 0 : index
    %33 = vector.load %arg3[%c0_15, %c0_16] : memref<8x512xf32, #tpu.memory_space<vmem>>, vector<8x512xf32>
    %cst_17 = arith.constant dense<0.000000e+00> : vector<2x512xf32>
    %34 = tpu.matmul %32, %33, %cst_17 {dimension_numbers = #tpu.dot_dimension_numbers<[1], [0], [0], [1], [0, 0, 1, 1], [], []>} : vector<2x8xf32>, vector<8x512xf32>, vector<2x512xf32> -> vector<2x512xf32>
    %35 = vector.extract_strided_slice %34 {offsets = [0, 0], sizes = [1, 512], strides = [1, 1]} : vector<2x512xf32> to vector<1x512xf32>
    %36 = vector.broadcast %35 : vector<1x512xf32> to vector<2x512xf32>
    %37 = arith.mulf %4, %36 : vector<2x512xf32>
    %38 = vector.extract_strided_slice %34 {offsets = [1, 0], sizes = [1, 512], strides = [1, 1]} : vector<2x512xf32> to vector<1x512xf32>
    %39 = vector.broadcast %38 : vector<1x512xf32> to vector<2x512xf32>
    %40 = arith.addf %37, %39 : vector<2x512xf32>
    %41 = arith.truncf %40 : vector<2x512xf32> to vector<2x512xbf16>
    %c0_18 = arith.constant 0 : index
    %c0_19 = arith.constant 0 : index
    %42 = vector.load %arg5[%c0_18, %c0_19] : memref<512x256xbf16, #tpu.memory_space<vmem>>, vector<512x256xbf16>
    %cst_20 = arith.constant dense<0.000000e+00> : vector<2x256xf32>
    %43 = tpu.matmul %41, %42, %cst_20 {dimension_numbers = #tpu.dot_dimension_numbers<[1], [0], [0], [1], [0, 0, 1, 1], [], []>} : vector<2x512xbf16>, vector<512x256xbf16>, vector<2x256xf32> -> vector<2x256xf32>
    %cst_21 = arith.constant 0.000000e+00 : f32
    %44 = vector.broadcast %cst_21 : f32 to vector<2x256xf32>
    %45 = arith.maximumf %43, %44 : vector<2x256xf32>
    %46 = arith.mulf %45, %45 : vector<2x256xf32>
    %47 = tpu.concatenate %45, %46 in 1 : vector<2x256xf32>, vector<2x256xf32> -> vector<2x512xf32>
    %cst_22 = arith.constant dense<0.000000e+00> : vector<512xf32>
    %48 = vector.multi_reduction <add>, %47, %cst_22 [0] : vector<2x512xf32> to vector<512xf32>
    %49 = vector.shape_cast %48 : vector<512xf32> to vector<1x512xf32>
    %50 = vector.extract_strided_slice %49 {offsets = [0, 0], sizes = [1, 256], strides = [1, 1]} : vector<1x512xf32> to vector<1x256xf32>
    %51 = vector.extract_strided_slice %49 {offsets = [0, 256], sizes = [1, 256], strides = [1, 1]} : vector<1x512xf32> to vector<1x256xf32>
    %52 = tpu.concatenate %50, %51 in 0 : vector<1x256xf32>, vector<1x256xf32> -> vector<2x256xf32>
    %c0_23 = arith.constant 0 : index
    %c0_24 = arith.constant 0 : index
    %53 = vector.load %arg6[%c0_23, %c0_24] : memref<256x16xf32, #tpu.memory_space<vmem>>, vector<256x16xf32>
    %cst_25 = arith.constant dense<0.000000e+00> : vector<2x16xf32>
    %54 = tpu.matmul %52, %53, %cst_25 {dimension_numbers = #tpu.dot_dimension_numbers<[1], [0], [0], [1], [0, 0, 1, 1], [], []>} : vector<2x256xf32>, vector<256x16xf32>, vector<2x16xf32> -> vector<2x16xf32>
    %55 = vector.extract_strided_slice %54 {offsets = [0, 0], sizes = [1, 16], strides = [1, 1]} : vector<2x16xf32> to vector<1x16xf32>
    %cst_26 = arith.constant 3.125000e-02 : f32
    %56 = vector.broadcast %cst_26 : f32 to vector<1x16xf32>
    %57 = arith.mulf %55, %56 : vector<1x16xf32>
    %58 = vector.extract_strided_slice %54 {offsets = [1, 0], sizes = [1, 16], strides = [1, 1]} : vector<2x16xf32> to vector<1x16xf32>
    %cst_27 = arith.constant 3.125000e-02 : f32
    %59 = vector.broadcast %cst_27 : f32 to vector<1x16xf32>
    %60 = arith.mulf %58, %59 : vector<1x16xf32>
    %61 = arith.mulf %57, %57 : vector<1x16xf32>
    %62 = arith.subf %60, %61 : vector<1x16xf32>
    %cst_28 = arith.constant 0.000000e+00 : f32
    %63 = vector.broadcast %cst_28 : f32 to vector<1x16xf32>
    %64 = arith.maximumf %62, %63 : vector<1x16xf32>
    %c0_29 = arith.constant 0 : index
    %c0_30 = arith.constant 0 : index
    %65 = vector.load %arg8[%c0_29, %c0_30] : memref<2x16xf32, #tpu.memory_space<vmem>>, vector<1x16xf32>
    %cst_31 = arith.constant 9.99999974E-6 : f32
    %66 = vector.broadcast %cst_31 : f32 to vector<1x16xf32>
    %67 = arith.addf %64, %66 : vector<1x16xf32>
    %68 = math.rsqrt %67 : vector<1x16xf32>
    %69 = arith.mulf %65, %68 : vector<1x16xf32>
    %c1_32 = arith.constant 1 : index
    %c0_33 = arith.constant 0 : index
    %70 = vector.load %arg8[%c1_32, %c0_33] : memref<2x16xf32, #tpu.memory_space<vmem>>, vector<1x16xf32>
    %71 = arith.mulf %57, %69 : vector<1x16xf32>
    %72 = arith.subf %70, %71 : vector<1x16xf32>
    %73 = tpu.concatenate %69, %72 in 0 : vector<1x16xf32>, vector<1x16xf32> -> vector<2x16xf32>
    %c0_34 = arith.constant 0 : index
    %c0_35 = arith.constant 0 : index
    %74 = vector.load %arg7[%c0_34, %c0_35] : memref<16x256xf32, #tpu.memory_space<vmem>>, vector<16x256xf32>
    %cst_36 = arith.constant dense<0.000000e+00> : vector<2x256xf32>
    %75 = tpu.matmul %73, %74, %cst_36 {dimension_numbers = #tpu.dot_dimension_numbers<[1], [0], [0], [1], [0, 0, 1, 1], [], []>} : vector<2x16xf32>, vector<16x256xf32>, vector<2x256xf32> -> vector<2x256xf32>
    %76 = vector.extract_strided_slice %75 {offsets = [0, 0], sizes = [1, 256], strides = [1, 1]} : vector<2x256xf32> to vector<1x256xf32>
    %77 = vector.broadcast %76 : vector<1x256xf32> to vector<2x256xf32>
    %78 = arith.mulf %45, %77 : vector<2x256xf32>
    %79 = vector.extract_strided_slice %75 {offsets = [1, 0], sizes = [1, 256], strides = [1, 1]} : vector<2x256xf32> to vector<1x256xf32>
    %80 = vector.broadcast %79 : vector<1x256xf32> to vector<2x256xf32>
    %81 = arith.addf %78, %80 : vector<2x256xf32>
    %82 = arith.truncf %81 : vector<2x256xf32> to vector<2x256xbf16>
    %c0_37 = arith.constant 0 : index
    %c0_38 = arith.constant 0 : index
    %83 = vector.load %arg9[%c0_37, %c0_38] : memref<256x128xbf16, #tpu.memory_space<vmem>>, vector<256x128xbf16>
    %cst_39 = arith.constant dense<0.000000e+00> : vector<2x128xf32>
    %84 = tpu.matmul %82, %83, %cst_39 {dimension_numbers = #tpu.dot_dimension_numbers<[1], [0], [0], [1], [0, 0, 1, 1], [], []>} : vector<2x256xbf16>, vector<256x128xbf16>, vector<2x128xf32> -> vector<2x128xf32>
    %cst_40 = arith.constant 0.000000e+00 : f32
    %85 = vector.broadcast %cst_40 : f32 to vector<2x128xf32>
    %86 = arith.maximumf %84, %85 : vector<2x128xf32>
    %87 = arith.mulf %86, %86 : vector<2x128xf32>
    %88 = tpu.concatenate %86, %87 in 1 : vector<2x128xf32>, vector<2x128xf32> -> vector<2x256xf32>
    %cst_41 = arith.constant dense<0.000000e+00> : vector<256xf32>
    %89 = vector.multi_reduction <add>, %88, %cst_41 [0] : vector<2x256xf32> to vector<256xf32>
    %90 = vector.shape_cast %89 : vector<256xf32> to vector<1x256xf32>
    %91 = vector.extract_strided_slice %90 {offsets = [0, 0], sizes = [1, 128], strides = [1, 1]} : vector<1x256xf32> to vector<1x128xf32>
    %92 = vector.extract_strided_slice %90 {offsets = [0, 128], sizes = [1, 128], strides = [1, 1]} : vector<1x256xf32> to vector<1x128xf32>
    %93 = tpu.concatenate %91, %92 in 0 : vector<1x128xf32>, vector<1x128xf32> -> vector<2x128xf32>
    %c0_42 = arith.constant 0 : index
    %c0_43 = arith.constant 0 : index
    %94 = vector.load %arg10[%c0_42, %c0_43] : memref<128x32xf32, #tpu.memory_space<vmem>>, vector<128x32xf32>
    %cst_44 = arith.constant dense<0.000000e+00> : vector<2x32xf32>
    %95 = tpu.matmul %93, %94, %cst_44 {dimension_numbers = #tpu.dot_dimension_numbers<[1], [0], [0], [1], [0, 0, 1, 1], [], []>} : vector<2x128xf32>, vector<128x32xf32>, vector<2x32xf32> -> vector<2x32xf32>
    %96 = vector.extract_strided_slice %95 {offsets = [0, 0], sizes = [1, 32], strides = [1, 1]} : vector<2x32xf32> to vector<1x32xf32>
    %cst_45 = arith.constant 1.250000e-01 : f32
    %97 = vector.broadcast %cst_45 : f32 to vector<1x32xf32>
    %98 = arith.mulf %96, %97 : vector<1x32xf32>
    %99 = vector.extract_strided_slice %95 {offsets = [1, 0], sizes = [1, 32], strides = [1, 1]} : vector<2x32xf32> to vector<1x32xf32>
    %cst_46 = arith.constant 1.250000e-01 : f32
    %100 = vector.broadcast %cst_46 : f32 to vector<1x32xf32>
    %101 = arith.mulf %99, %100 : vector<1x32xf32>
    %102 = arith.mulf %98, %98 : vector<1x32xf32>
    %103 = arith.subf %101, %102 : vector<1x32xf32>
    %cst_47 = arith.constant 0.000000e+00 : f32
    %104 = vector.broadcast %cst_47 : f32 to vector<1x32xf32>
    %105 = arith.maximumf %103, %104 : vector<1x32xf32>
    %c0_48 = arith.constant 0 : index
    %c0_49 = arith.constant 0 : index
    %106 = vector.load %arg12[%c0_48, %c0_49] : memref<2x32xf32, #tpu.memory_space<vmem>>, vector<1x32xf32>
    %cst_50 = arith.constant 9.99999974E-6 : f32
    %107 = vector.broadcast %cst_50 : f32 to vector<1x32xf32>
    %108 = arith.addf %105, %107 : vector<1x32xf32>
    %109 = math.rsqrt %108 : vector<1x32xf32>
    %110 = arith.mulf %106, %109 : vector<1x32xf32>
    %c1_51 = arith.constant 1 : index
    %c0_52 = arith.constant 0 : index
    %111 = vector.load %arg12[%c1_51, %c0_52] : memref<2x32xf32, #tpu.memory_space<vmem>>, vector<1x32xf32>
    %112 = arith.mulf %98, %110 : vector<1x32xf32>
    %113 = arith.subf %111, %112 : vector<1x32xf32>
    %114 = tpu.concatenate %110, %113 in 0 : vector<1x32xf32>, vector<1x32xf32> -> vector<2x32xf32>
    %c0_53 = arith.constant 0 : index
    %c0_54 = arith.constant 0 : index
    %115 = vector.load %arg11[%c0_53, %c0_54] : memref<32x128xf32, #tpu.memory_space<vmem>>, vector<32x128xf32>
    %cst_55 = arith.constant dense<0.000000e+00> : vector<2x128xf32>
    %116 = tpu.matmul %114, %115, %cst_55 {dimension_numbers = #tpu.dot_dimension_numbers<[1], [0], [0], [1], [0, 0, 1, 1], [], []>} : vector<2x32xf32>, vector<32x128xf32>, vector<2x128xf32> -> vector<2x128xf32>
    %117 = vector.extract_strided_slice %116 {offsets = [0, 0], sizes = [1, 128], strides = [1, 1]} : vector<2x128xf32> to vector<1x128xf32>
    %118 = vector.broadcast %117 : vector<1x128xf32> to vector<2x128xf32>
    %119 = arith.mulf %86, %118 : vector<2x128xf32>
    %120 = vector.extract_strided_slice %116 {offsets = [1, 0], sizes = [1, 128], strides = [1, 1]} : vector<2x128xf32> to vector<1x128xf32>
    %121 = vector.broadcast %120 : vector<1x128xf32> to vector<2x128xf32>
    %122 = arith.addf %119, %121 : vector<2x128xf32>
    %123 = arith.truncf %122 : vector<2x128xf32> to vector<2x128xbf16>
    %c0_56 = arith.constant 0 : index
    %c0_57 = arith.constant 0 : index
    %124 = vector.load %arg13[%c0_56, %c0_57] : memref<128x64xbf16, #tpu.memory_space<vmem>>, vector<128x64xbf16>
    %cst_58 = arith.constant dense<0.000000e+00> : vector<2x64xf32>
    %125 = tpu.matmul %123, %124, %cst_58 {dimension_numbers = #tpu.dot_dimension_numbers<[1], [0], [0], [1], [0, 0, 1, 1], [], []>} : vector<2x128xbf16>, vector<128x64xbf16>, vector<2x64xf32> -> vector<2x64xf32>
    %cst_59 = arith.constant 0.000000e+00 : f32
    %126 = vector.broadcast %cst_59 : f32 to vector<2x64xf32>
    %127 = arith.maximumf %125, %126 : vector<2x64xf32>
    %128 = arith.mulf %127, %127 : vector<2x64xf32>
    %129 = tpu.concatenate %127, %128 in 1 : vector<2x64xf32>, vector<2x64xf32> -> vector<2x128xf32>
    %cst_60 = arith.constant dense<0.000000e+00> : vector<128xf32>
    %130 = vector.multi_reduction <add>, %129, %cst_60 [0] : vector<2x128xf32> to vector<128xf32>
    %131 = vector.shape_cast %130 : vector<128xf32> to vector<1x128xf32>
    %132 = vector.extract_strided_slice %131 {offsets = [0, 0], sizes = [1, 64], strides = [1, 1]} : vector<1x128xf32> to vector<1x64xf32>
    %133 = vector.extract_strided_slice %131 {offsets = [0, 64], sizes = [1, 64], strides = [1, 1]} : vector<1x128xf32> to vector<1x64xf32>
    %134 = tpu.concatenate %132, %133 in 0 : vector<1x64xf32>, vector<1x64xf32> -> vector<2x64xf32>
    %c0_61 = arith.constant 0 : index
    %c0_62 = arith.constant 0 : index
    %135 = vector.load %arg14[%c0_61, %c0_62] : memref<64x64xf32, #tpu.memory_space<vmem>>, vector<64x64xf32>
    %cst_63 = arith.constant dense<0.000000e+00> : vector<2x64xf32>
    %136 = tpu.matmul %134, %135, %cst_63 {dimension_numbers = #tpu.dot_dimension_numbers<[1], [0], [0], [1], [0, 0, 1, 1], [], []>} : vector<2x64xf32>, vector<64x64xf32>, vector<2x64xf32> -> vector<2x64xf32>
    %137 = vector.extract_strided_slice %136 {offsets = [0, 0], sizes = [1, 64], strides = [1, 1]} : vector<2x64xf32> to vector<1x64xf32>
    %cst_64 = arith.constant 5.000000e-01 : f32
    %138 = vector.broadcast %cst_64 : f32 to vector<1x64xf32>
    %139 = arith.mulf %137, %138 : vector<1x64xf32>
    %140 = vector.extract_strided_slice %136 {offsets = [1, 0], sizes = [1, 64], strides = [1, 1]} : vector<2x64xf32> to vector<1x64xf32>
    %cst_65 = arith.constant 5.000000e-01 : f32
    %141 = vector.broadcast %cst_65 : f32 to vector<1x64xf32>
    %142 = arith.mulf %140, %141 : vector<1x64xf32>
    %143 = arith.mulf %139, %139 : vector<1x64xf32>
    %144 = arith.subf %142, %143 : vector<1x64xf32>
    %cst_66 = arith.constant 0.000000e+00 : f32
    %145 = vector.broadcast %cst_66 : f32 to vector<1x64xf32>
    %146 = arith.maximumf %144, %145 : vector<1x64xf32>
    %c0_67 = arith.constant 0 : index
    %c0_68 = arith.constant 0 : index
    %147 = vector.load %arg16[%c0_67, %c0_68] : memref<2x64xf32, #tpu.memory_space<vmem>>, vector<1x64xf32>
    %cst_69 = arith.constant 9.99999974E-6 : f32
    %148 = vector.broadcast %cst_69 : f32 to vector<1x64xf32>
    %149 = arith.addf %146, %148 : vector<1x64xf32>
    %150 = math.rsqrt %149 : vector<1x64xf32>
    %151 = arith.mulf %147, %150 : vector<1x64xf32>
    %c1_70 = arith.constant 1 : index
    %c0_71 = arith.constant 0 : index
    %152 = vector.load %arg16[%c1_70, %c0_71] : memref<2x64xf32, #tpu.memory_space<vmem>>, vector<1x64xf32>
    %153 = arith.mulf %139, %151 : vector<1x64xf32>
    %154 = arith.subf %152, %153 : vector<1x64xf32>
    %155 = tpu.concatenate %151, %154 in 0 : vector<1x64xf32>, vector<1x64xf32> -> vector<2x64xf32>
    %c0_72 = arith.constant 0 : index
    %c0_73 = arith.constant 0 : index
    %156 = vector.load %arg15[%c0_72, %c0_73] : memref<64x64xf32, #tpu.memory_space<vmem>>, vector<64x64xf32>
    %cst_74 = arith.constant dense<0.000000e+00> : vector<2x64xf32>
    %157 = tpu.matmul %155, %156, %cst_74 {dimension_numbers = #tpu.dot_dimension_numbers<[1], [0], [0], [1], [0, 0, 1, 1], [], []>} : vector<2x64xf32>, vector<64x64xf32>, vector<2x64xf32> -> vector<2x64xf32>
    %158 = vector.extract_strided_slice %157 {offsets = [0, 0], sizes = [1, 64], strides = [1, 1]} : vector<2x64xf32> to vector<1x64xf32>
    %159 = vector.broadcast %158 : vector<1x64xf32> to vector<2x64xf32>
    %160 = arith.mulf %127, %159 : vector<2x64xf32>
    %161 = vector.extract_strided_slice %157 {offsets = [1, 0], sizes = [1, 64], strides = [1, 1]} : vector<2x64xf32> to vector<1x64xf32>
    %162 = vector.broadcast %161 : vector<1x64xf32> to vector<2x64xf32>
    %163 = arith.addf %160, %162 : vector<2x64xf32>
    %164 = arith.truncf %163 : vector<2x64xf32> to vector<2x64xbf16>
    %c0_75 = arith.constant 0 : index
    %c0_76 = arith.constant 0 : index
    %165 = vector.load %arg17[%c0_75, %c0_76] : memref<64x128xbf16, #tpu.memory_space<vmem>>, vector<64x128xbf16>
    %cst_77 = arith.constant dense<0.000000e+00> : vector<2x128xf32>
    %166 = tpu.matmul %164, %165, %cst_77 {dimension_numbers = #tpu.dot_dimension_numbers<[1], [0], [0], [1], [0, 0, 1, 1], [], []>} : vector<2x64xbf16>, vector<64x128xbf16>, vector<2x128xf32> -> vector<2x128xf32>
    %c0_78 = arith.constant 0 : index
    %c0_79 = arith.constant 0 : index
    %167 = vector.load %arg18[%c0_78, %c0_79] : memref<1x128xf32, #tpu.memory_space<vmem>>, vector<1x128xf32>
    %168 = vector.broadcast %167 : vector<1x128xf32> to vector<2x128xf32>
    %169 = arith.addf %166, %168 : vector<2x128xf32>
    %c0_80 = arith.constant 0 : index
    %c0_81 = arith.constant 0 : index
    %170 = vector.load %arg19[%c0_80, %c0_81] : memref<2x128xf32, #tpu.memory_space<vmem>>, vector<2x128xf32>
    tpu.vector_store %arg19[%c0_80, %c0_81], %169 {strides = array<i32>} : memref<2x128xf32, #tpu.memory_space<vmem>>, vector<2x128xf32>,
    return
  }
}

</mosaic_0001>

<bundles_post_ra>
// kernel: zfinch_forward.1
= control target key start
LH: loop header
LB: loop body
LE: loop exit
PB: predicated region body
PF: predicated region fallthrough
CT: control target
= control target key end

     0   :  { %s4129_s0 = inlined_call_operand.vmem [shape: bf16[2,256], index: 0, kind: input, shape index: {}]   ;;  %s4130_s1 = inlined_call_operand.vmem [shape: bf16[256,512], index: 1, kind: input, shape index: {}]   ;;  %s4131_s2 = inlined_call_operand.vmem [shape: f32[512,8], index: 2, kind: input, shape index: {}]   ;;  %s4132_s3 = inlined_call_operand.vmem [shape: f32[8,512], index: 3, kind: input, shape index: {}]   ;;  %s4133_s4 = inlined_call_operand.vmem [shape: f32[2,8], index: 4, kind: input, shape index: {}]   ;;  %s4134_s5 = inlined_call_operand.hbm [shape: bf16[512,256], index: 5, kind: input, shape index: {}]   ;;  %s4135_s6 = inlined_call_operand.vmem [shape: f32[256,16], index: 6, kind: input, shape index: {}]   ;;  %s4136_s7 = inlined_call_operand.vmem [shape: f32[16,256], index: 7, kind: input, shape index: {}]   ;;  %s4137_s8 = inlined_call_operand.vmem [shape: f32[2,16], index: 8, kind: input, shape index: {}]   ;;  %s4138_s9 = inlined_call_operand.vmem [shape: bf16[256,128], index: 9, kind: input, shape index: {}]   ;;  %s4139_s10 = inlined_call_operand.vmem [shape: f32[128,32], index: 10, kind: input, shape index: {}]   ;;  %s4140_s11 = inlined_call_operand.vmem [shape: f32[32,128], index: 11, kind: input, shape index: {}]   ;;  %s4141_s12 = inlined_call_operand.vmem [shape: f32[2,32], index: 12, kind: input, shape index: {}]   ;;  %s4142_s13 = inlined_call_operand.vmem [shape: bf16[128,64], index: 13, kind: input, shape index: {}]   ;;  %s4143_s14 = inlined_call_operand.vmem [shape: f32[64,64], index: 14, kind: input, shape index: {}]   ;;  %s4144_s15 = inlined_call_operand.vmem [shape: f32[64,64], index: 15, kind: input, shape index: {}]   ;;  %s4145_s16 = inlined_call_operand.vmem [shape: f32[2,64], index: 16, kind: input, shape index: {}]   ;;  %s4146_s17 = inlined_call_operand.vmem [shape: bf16[64,128], index: 17, kind: input, shape index: {}]   ;;  %s4147_s18 = inlined_call_operand.vmem [shape: f32[1,128], index: 18, kind: input, shape index: {}]   ;;  %s4148_s19 = inlined_call_operand.hbm [shape: f32[2,128], index: 19, kind: output, shape index: {}]  }
   0x1   :  { %4152 = sst [smem:[#allocation8_spill]] %s4129_s0 }
   0x2   :  { %4153 = sst [smem:[#allocation9_spill]] %s4130_s1 }
   0x3   :  { %4154 = sst [smem:[#allocation10_spill]] %s4131_s2 }
   0x4   :  { %4155 = sst [smem:[#allocation11_spill]] %s4132_s3 }
   0x5   :  { %24 = vsyncpa [#allocation3], 0 }
   0x6   :  { %25 = vsyncpa [#allocation4], 0  ;;  %s40_s20 = sshll.u32 %s4134_s5, 4  ;;  %s2999_s21 = smov [#allocation2]   ;;  %s41_s20 = int_to_ptr.hbm [resolvable:$true] %s40_s20 }
   0x7   :  { %s42_s1 = sshll.u32 %s2999_s21, 4  ;;  %s3000_s22 = smov 128   ;;  %s43_s1 = int_to_ptr.vmem [resolvable:$true] %s42_s1 }
   0x8   :  { %s3001_s2 = smov 8  }
   0x9   :  { %48 = dma.hbm_to_vmem [thread:$0]  %s41_s20, 8192, %s43_s1, [#allocation3], %s3000_s22, %s3000_s22, %s3001_s2  }
   0xa   :  { %2995 = dma.done.wait [#allocation3], 8192  }
   0xb   :  { %2996 = vsyncadd [#allocation3], 4294959104  ;;  %s4156_s25 = sld [smem:[#allocation9_spill]]  ;;  %vm583_vm0 = vcmask 1041408   ;;  %vm640_vm1 = vcmask 1040384   ;;  %vm823_vm5 = vcmask 64512  }
   0xc   :  { %s4157_s26 = sld [smem:[#allocation8_spill]]  ;;  %vm1555_vm9 = vcmask 130048   ;;  %vm1850_vm13 = vcmask 261120   ;;  %vm1962_vm14 = vcmask 523264   ;;  %s3003_s23 = smov [#allocation5]  }
   0xd   :  { %s4158_s5 = sld [smem:[#allocation10_spill]]  ;;  %s2131_s24 = sshll.u32 %s3003_s23, 4  ;;  %s2132_s24 = int_to_ptr.vmem [resolvable:$true] %s2131_s24 }
   0xe   :  { %s4159_s22 = sld [smem:[#allocation11_spill]] }
  0x11   :  { %v2257_v0 = vld [vmem:[%s4156_s25 + $0xe0] sm:$0xf]  ;;  %v2807_v1 = vld [vmem:[%s4156_s25 + $0xec] sm:$0xf0]  ;;  %v2805_v5 = vld [vmem:[%s4156_s25 + $0xe4] sm:$0xf] }
  0x12   :  { %v2385_v2 = vld [vmem:[%s4156_s25 + $0x1e0] sm:$0xf]  ;;  %v2258_v3 = vor.u32 %v2807_v1, %v2257_v0  ;;  %v2839_v4 = vld [vmem:[%s4156_s25 + $0x1ec] sm:$0xf0]  ;;  %v2259_v6 = vld [vmem:[%s4156_s25 + $0xf0] sm:$0xf0] }
  0x13   :  { %v2386_v7 = vor.u32 %v2839_v4, %v2385_v2  ;;  %v2262_v8 = vor.u32 %v2805_v5, %v2259_v6  ;;  %v2837_v9 = vld [vmem:[%s4156_s25 + $0x1e4] sm:$0xf]  ;;  %v2387_v10 = vld [vmem:[%s4156_s25 + $0x1f0] sm:$0xf0]  ;;  %v2241_v11 = vld [vmem:[%s4156_s25 + $0xc0] sm:$0xf] }
  0x14   :  { %471 = vmatpush.bf16.msra.mxu0 %v2258_v3  ;;  %v2390_v12 = vor.u32 %v2837_v9, %v2387_v10  ;;  %v2803_v13 = vld [vmem:[%s4156_s25 + $0xcc] sm:$0xf0]  ;;  %v2369_v14 = vld [vmem:[%s4156_s25 + $0x1c0] sm:$0xf]  ;;  %v2801_v18 = vld [vmem:[%s4156_s25 + $0xc4] sm:$0xf] }
  0x15   :  { %v2835_v15 = vld [vmem:[%s4156_s25 + $0x1cc] sm:$0xf0]  ;;  %484 = vmatpush.bf16.msra.mxu1 %v2386_v7  ;;  %497 = vmatpush.bf16.msra.mxu2 %v2262_v8  ;;  %v2242_v16 = vor.u32 %v2803_v13, %v2241_v11  ;;  %v2243_v19 = vld [vmem:[%s4156_s25 + $0xd0] sm:$0xf0]  ;;  %v2833_v20 = vld [vmem:[%s4156_s25 + $0x1c4] sm:$0xf] }
  0x16   :  { %v2370_v17 = vor.u32 %v2835_v15, %v2369_v14  ;;  %510 = vmatpush.bf16.msra.mxu3 %v2390_v12  ;;  %v2246_v21 = vor.u32 %v2801_v18, %v2243_v19  ;;  %v2371_v22 = vld [vmem:[%s4156_s25 + $0x1d0] sm:$0xf0]  ;;  %v2225_v23 = vld [vmem:[%s4156_s25 + $0xa0] sm:$0xf]  ;;  %v2799_v24 = vld [vmem:[%s4156_s25 + $0xac] sm:$0xf0] }
  0x17   :  { %v2374_v25 = vor.u32 %v2833_v20, %v2371_v22  ;;  %v2353_v26 = vld [vmem:[%s4156_s25 + $0x1a0] sm:$0xf]  ;;  %v2831_v27 = vld [vmem:[%s4156_s25 + $0x1ac] sm:$0xf0]  ;;  %v2797_v28 = vld [vmem:[%s4156_s25 + $0xa4] sm:$0xf]  ;;  %v2226_v29 = vor.u32 %v2799_v24, %v2225_v23 }
  0x18   :  { %472 = vmatpush.bf16.msra.mxu0 %v2242_v16  ;;  %v2227_v30 = vld [vmem:[%s4156_s25 + $0xb0] sm:$0xf0]  ;;  %v2829_v31 = vld [vmem:[%s4156_s25 + $0x1a4] sm:$0xf]  ;;  %v2354_v33 = vor.u32 %v2831_v27, %v2353_v26  ;;  %v2209_v35 = vld [vmem:[%s4156_s25 + $0x80] sm:$0xf] }
  0x19   :  { %v2355_v32 = vld [vmem:[%s4156_s25 + $0x1b0] sm:$0xf0]  ;;  %485 = vmatpush.bf16.msra.mxu1 %v2370_v17  ;;  %498 = vmatpush.bf16.msra.mxu2 %v2246_v21  ;;  %v2230_v34 = vor.u32 %v2797_v28, %v2227_v30  ;;  %v2795_v36 = vld [vmem:[%s4156_s25 + $0x8c] sm:$0xf0]  ;;  %v2337_v37 = vld [vmem:[%s4156_s25 + $0x180] sm:$0xf] }
  0x1a   :  { %511 = vmatpush.bf16.msra.mxu3 %v2374_v25  ;;  %v2358_v38 = vor.u32 %v2829_v31, %v2355_v32  ;;  %v2827_v39 = vld [vmem:[%s4156_s25 + $0x18c] sm:$0xf0]  ;;  %v2793_v40 = vld [vmem:[%s4156_s25 + $0x84] sm:$0xf]  ;;  %v2211_v41 = vld [vmem:[%s4156_s25 + $0x90] sm:$0xf0]  ;;  %v2210_v44 = vor.u32 %v2795_v36, %v2209_v35 }
  0x1b   :  { %v2825_v42 = vld [vmem:[%s4156_s25 + $0x184] sm:$0xf]  ;;  %v2339_v43 = vld [vmem:[%s4156_s25 + $0x190] sm:$0xf0]  ;;  %v2338_v45 = vor.u32 %v2827_v39, %v2337_v37  ;;  %v2214_v46 = vor.u32 %v2793_v40, %v2211_v41  ;;  %v2193_v47 = vld [vmem:[%s4156_s25 + $0x60] sm:$0xf] }
  0x1c   :  { %473 = vmatpush.bf16.msra.mxu0 %v2226_v29  ;;  %v2791_v48 = vld [vmem:[%s4156_s25 + $0x6c] sm:$0xf0]  ;;  %v2321_v49 = vld [vmem:[%s4156_s25 + $0x160] sm:$0xf]  ;;  %v2342_v50 = vor.u32 %v2825_v42, %v2339_v43  ;;  %v2789_v52 = vld [vmem:[%s4156_s25 + $0x64] sm:$0xf] }
  0x1d   :  { %486 = vmatpush.bf16.msra.mxu1 %v2354_v33  ;;  %499 = vmatpush.bf16.msra.mxu2 %v2230_v34  ;;  %v2823_v51 = vld [vmem:[%s4156_s25 + $0x16c] sm:$0xf0]  ;;  %v2195_v53 = vld [vmem:[%s4156_s25 + $0x70] sm:$0xf0]  ;;  %v2821_v54 = vld [vmem:[%s4156_s25 + $0x164] sm:$0xf]  ;;  %v2194_v56 = vor.u32 %v2791_v48, %v2193_v47 }
  0x1e   :  { %512 = vmatpush.bf16.msra.mxu3 %v2358_v38  ;;  %v2323_v55 = vld [vmem:[%s4156_s25 + $0x170] sm:$0xf0]  ;;  %v2322_v57 = vor.u32 %v2823_v51, %v2321_v49  ;;  %v2198_v58 = vor.u32 %v2789_v52, %v2195_v53  ;;  %v2177_v59 = vld [vmem:[%s4156_s25 + $0x40] sm:$0xf]  ;;  %v2787_v60 = vld [vmem:[%s4156_s25 + $0x4c] sm:$0xf0] }
  0x1f   :  { %v2305_v61 = vld [vmem:[%s4156_s25 + $0x140] sm:$0xf]  ;;  %v2326_v62 = vor.u32 %v2821_v54, %v2323_v55  ;;  %v2819_v63 = vld [vmem:[%s4156_s25 + $0x14c] sm:$0xf0]  ;;  %v2785_v0 = vld [vmem:[%s4156_s25 + $0x44] sm:$0xf]  ;;  %v2178_v4 = vor.u32 %v2787_v60, %v2177_v59 }
  0x20   :  { %474 = vmatpush.bf16.msra.mxu0 %v2210_v44  ;;  %v2179_v1 = vld [vmem:[%s4156_s25 + $0x50] sm:$0xf0]  ;;  %v2817_v2 = vld [vmem:[%s4156_s25 + $0x144] sm:$0xf]  ;;  %v2306_v5 = vor.u32 %v2819_v63, %v2305_v61  ;;  %v2161_v7 = vld [vmem:[%s4156_s25 + $0x20] sm:$0xf] }
  0x21   :  { %487 = vmatpush.bf16.msra.mxu1 %v2338_v45  ;;  %500 = vmatpush.bf16.msra.mxu2 %v2214_v46  ;;  %v2307_v3 = vld [vmem:[%s4156_s25 + $0x150] sm:$0xf0]  ;;  %v2182_v6 = vor.u32 %v2785_v0, %v2179_v1  ;;  %v2783_v8 = vld [vmem:[%s4156_s25 + $0x2c] sm:$0xf0]  ;;  %v2289_v9 = vld [vmem:[%s4156_s25 + $0x120] sm:$0xf] }
  0x22   :  { %513 = vmatpush.bf16.msra.mxu3 %v2342_v50  ;;  %v2310_v10 = vor.u32 %v2817_v2, %v2307_v3  ;;  %v2815_v11 = vld [vmem:[%s4156_s25 + $0x12c] sm:$0xf0]  ;;  %v2781_v12 = vld [vmem:[%s4156_s25 + $0x24] sm:$0xf]  ;;  %v2163_v13 = vld [vmem:[%s4156_s25 + $0x30] sm:$0xf0]  ;;  %v2162_v17 = vor.u32 %v2783_v8, %v2161_v7 }
  0x23   :  { %v2813_v14 = vld [vmem:[%s4156_s25 + $0x124] sm:$0xf]  ;;  %v2291_v15 = vld [vmem:[%s4156_s25 + $0x130] sm:$0xf0]  ;;  %v2145_v16 = vld [vmem:[%s4156_s25] sm:$0xf]  ;;  %v2290_v21 = vor.u32 %v2815_v11, %v2289_v9  ;;  %v2166_v22 = vor.u32 %v2781_v12, %v2163_v13 }
  0x24   :  { %475 = vmatpush.bf16.msra.mxu0 %v2194_v56  ;;  %v2779_v18 = vld [vmem:[%s4156_s25 + $0xc] sm:$0xf0]  ;;  %v2273_v19 = vld [vmem:[%s4156_s25 + $0x100] sm:$0xf]  ;;  %v2777_v23 = vld [vmem:[%s4156_s25 + $0x4] sm:$0xf]  ;;  %v2294_v26 = vor.u32 %v2813_v14, %v2291_v15 }
  0x25   :  { %488 = vmatpush.bf16.msra.mxu1 %v2322_v57  ;;  %501 = vmatpush.bf16.msra.mxu2 %v2198_v58  ;;  %v2811_v20 = vld [vmem:[%s4156_s25 + $0x10c] sm:$0xf0]  ;;  %v2147_v24 = vld [vmem:[%s4156_s25 + $0x10] sm:$0xf0]  ;;  %v2809_v25 = vld [vmem:[%s4156_s25 + $0x104] sm:$0xf]  ;;  %v2146_v33 = vor.u32 %v2779_v18, %v2145_v16 }
  0x26   :  { %514 = vmatpush.bf16.msra.mxu3 %v2326_v62  ;;  %v2275_v27 = vld [vmem:[%s4156_s25 + $0x110] sm:$0xf0]  ;;  %v2265_v28 = vld [vmem:[%s4156_s25 + $0xe8] sm:$0xf]  ;;  %v2808_v29 = vld [vmem:[%s4156_s25 + $0xf4] sm:$0xf0]  ;;  %v2274_v36 = vor.u32 %v2811_v20, %v2273_v19  ;;  %v2150_v37 = vor.u32 %v2777_v23, %v2147_v24 }
  0x27   :  { %v2393_v30 = vld [vmem:[%s4156_s25 + $0x1e8] sm:$0xf]  ;;  %v2840_v31 = vld [vmem:[%s4156_s25 + $0x1f4] sm:$0xf0]  ;;  %v80_v32 = vld [vmem:[%s4157_s26] sm:$0x3]  ;;  %v2278_v40 = vor.u32 %v2809_v25, %v2275_v27  ;;  %v2266_v41 = vor.u32 %v2808_v29, %v2265_v28 }
  0x28   :  { %476 = vmatpush.bf16.msra.mxu0 %v2178_v4  ;;  %v2806_v34 = vld [vmem:[%s4156_s25 + $0xec] sm:$0xf]  ;;  %v2267_v35 = vld [vmem:[%s4156_s25 + $0xf8] sm:$0xf0]  ;;  %146 = vst [vmem:[#allocation1] ss:$9 sm:$0xff] %v80_v32  ;;  %v2394_v42 = vor.u32 %v2840_v31, %v2393_v30 }
  0x29   :  { %489 = vmatpush.bf16.msra.mxu1 %v2306_v5  ;;  %502 = vmatpush.bf16.msra.mxu2 %v2182_v6  ;;  %v2838_v38 = vld [vmem:[%s4156_s25 + $0x1ec] sm:$0xf]  ;;  %v2395_v39 = vld [vmem:[%s4156_s25 + $0x1f8] sm:$0xf0]  ;;  %v2270_v43 = vor.u32 %v2806_v34, %v2267_v35  ;;  %v2249_v44 = vld [vmem:[%s4156_s25 + $0xc8] sm:$0xf] }
  0x2a   :  { %515 = vmatpush.bf16.msra.mxu3 %v2310_v10  ;;  %v2804_v45 = vld [vmem:[%s4156_s25 + $0xd4] sm:$0xf0]  ;;  %v2377_v46 = vld [vmem:[%s4156_s25 + $0x1c8] sm:$0xf]  ;;  %v2398_v47 = vor.u32 %v2838_v38, %v2395_v39  ;;  %v2802_v49 = vld [vmem:[%s4156_s25 + $0xcc] sm:$0xf] }
  0x2b   :  { %v2836_v48 = vld [vmem:[%s4156_s25 + $0x1d4] sm:$0xf0]  ;;  %v2251_v50 = vld [vmem:[%s4156_s25 + $0xd8] sm:$0xf0]  ;;  %v2834_v51 = vld [vmem:[%s4156_s25 + $0x1cc] sm:$0xf]  ;;  %v2250_v53 = vor.u32 %v2804_v45, %v2249_v44 }
  0x2c   :  { %477 = vmatpush.bf16.msra.mxu0 %v2162_v17  ;;  %v2379_v52 = vld [vmem:[%s4156_s25 + $0x1d8] sm:$0xf0]  ;;  %v2233_v54 = vld [vmem:[%s4156_s25 + $0xa8] sm:$0xf]  ;;  %v2800_v55 = vld [vmem:[%s4156_s25 + $0xb4] sm:$0xf0]  ;;  %v2378_v56 = vor.u32 %v2836_v48, %v2377_v46  ;;  %v2254_v57 = vor.u32 %v2802_v49, %v2251_v50 }
  0x2d   :  { %490 = vmatpush.bf16.msra.mxu1 %v2290_v21  ;;  %503 = vmatpush.bf16.msra.mxu2 %v2166_v22  ;;  %v2361_v60 = vld [vmem:[%s4156_s25 + $0x1a8] sm:$0xf]  ;;  %v2382_v61 = vor.u32 %v2834_v51, %v2379_v52  ;;  %v2832_v62 = vld [vmem:[%s4156_s25 + $0x1b4] sm:$0xf0]  ;;  %v2798_v63 = vld [vmem:[%s4156_s25 + $0xac] sm:$0xf]  ;;  %v2234_v3 = vor.u32 %v2800_v55, %v2233_v54 }
  0x2e   :  { %516 = vmatpush.bf16.msra.mxu3 %v2294_v26  ;;  %v2235_v0 = vld [vmem:[%s4156_s25 + $0xb8] sm:$0xf0]  ;;  %v2830_v1 = vld [vmem:[%s4156_s25 + $0x1ac] sm:$0xf]  ;;  %v2362_v4 = vor.u32 %v2832_v62, %v2361_v60  ;;  %v2217_v6 = vld [vmem:[%s4156_s25 + $0x88] sm:$0xf] }
  0x2f   :  { %v3356_v58 = vld [vmem:[#allocation1] sm:$0xff]  ;;  %v3358_v59 = vld [vmem:[#allocation1 + $0x9] sm:$0xff]  ;;  %v2363_v2 = vld [vmem:[%s4156_s25 + $0x1b8] sm:$0xf0]  ;;  %v2238_v5 = vor.u32 %v2798_v63, %v2235_v0 }
  0x30   :  { %478 = vmatpush.bf16.msra.mxu0 %v2146_v33  ;;  %v2796_v7 = vld [vmem:[%s4156_s25 + $0x94] sm:$0xf0]  ;;  %v2345_v8 = vld [vmem:[%s4156_s25 + $0x188] sm:$0xf]  ;;  %v2366_v9 = vor.u32 %v2830_v1, %v2363_v2  ;;  %v2794_v11 = vld [vmem:[%s4156_s25 + $0x8c] sm:$0xf] }
  0x31   :  { %491 = vmatpush.bf16.msra.mxu1 %v2274_v36  ;;  %504 = vmatpush.bf16.msra.mxu2 %v2150_v37  ;;  %v2828_v10 = vld [vmem:[%s4156_s25 + $0x194] sm:$0xf0]  ;;  %v2219_v12 = vld [vmem:[%s4156_s25 + $0x98] sm:$0xf0]  ;;  %v2826_v13 = vld [vmem:[%s4156_s25 + $0x18c] sm:$0xf]  ;;  %v2218_v15 = vor.u32 %v2796_v7, %v2217_v6 }
  0x32   :  { %517 = vmatpush.bf16.msra.mxu3 %v2278_v40  ;;  %v2347_v14 = vld [vmem:[%s4156_s25 + $0x198] sm:$0xf0]  ;;  %v2346_v16 = vor.u32 %v2828_v10, %v2345_v8  ;;  %v2222_v17 = vor.u32 %v2794_v11, %v2219_v12  ;;  %v2201_v18 = vld [vmem:[%s4156_s25 + $0x68] sm:$0xf]  ;;  %v2792_v19 = vld [vmem:[%s4156_s25 + $0x74] sm:$0xf0] }
  0x33   :  { %479 = vmatmul.bf16.vlgmr.msra.gmra.mxu0 %v3356_v58  ;;  %v2329_v20 = vld [vmem:[%s4156_s25 + $0x168] sm:$0xf]  ;;  %v2350_v21 = vor.u32 %v2826_v13, %v2347_v14  ;;  %v2824_v22 = vld [vmem:[%s4156_s25 + $0x174] sm:$0xf0]  ;;  %v2790_v23 = vld [vmem:[%s4156_s25 + $0x6c] sm:$0xf]  ;;  %v2202_v27 = vor.u32 %v2792_v19, %v2201_v18 }
  0x34   :  { %523 = vmatpush.bf16.msrb.mxu0 %v2266_v41  ;;  %505 = vmatmul.bf16.vlgmr.msra.gmra.mxu2 %v3356_v58  ;;  %v2203_v24 = vld [vmem:[%s4156_s25 + $0x78] sm:$0xf0]  ;;  %v2822_v25 = vld [vmem:[%s4156_s25 + $0x16c] sm:$0xf]  ;;  %v2185_v28 = vld [vmem:[%s4156_s25 + $0x48] sm:$0xf]  ;;  %v2330_v29 = vor.u32 %v2824_v22, %v2329_v20 }
  0x35   :  { %536 = vmatpush.bf16.msrb.mxu1 %v2394_v42  ;;  %549 = vmatpush.bf16.msrb.mxu2 %v2270_v43  ;;  %v2331_v26 = vld [vmem:[%s4156_s25 + $0x178] sm:$0xf0]  ;;  %v2206_v30 = vor.u32 %v2790_v23, %v2203_v24  ;;  %v2788_v31 = vld [vmem:[%s4156_s25 + $0x54] sm:$0xf0]  ;;  %v2313_v32 = vld [vmem:[%s4156_s25 + $0x148] sm:$0xf] }
  0x36   :  { %562 = vmatpush.bf16.msrb.mxu3 %v2398_v47  ;;  %492 = vmatmul.bf16.vlgmr.msra.gmra.mxu1 %v3358_v59  ;;  %v2820_v33 = vld [vmem:[%s4156_s25 + $0x154] sm:$0xf0]  ;;  %v2334_v34 = vor.u32 %v2822_v25, %v2331_v26  ;;  %v2786_v35 = vld [vmem:[%s4156_s25 + $0x4c] sm:$0xf]  ;;  %v2187_v36 = vld [vmem:[%s4156_s25 + $0x58] sm:$0xf0]  ;;  %v2186_v39 = vor.u32 %v2788_v31, %v2185_v28 }
  0x37   :  { %518 = vmatmul.bf16.vlgmr.msra.gmra.mxu3 %v3358_v59  ;;  %v2818_v37 = vld [vmem:[%s4156_s25 + $0x14c] sm:$0xf]  ;;  %v2315_v38 = vld [vmem:[%s4156_s25 + $0x158] sm:$0xf0]  ;;  %v2314_v40 = vor.u32 %v2820_v33, %v2313_v32  ;;  %v2190_v41 = vor.u32 %v2786_v35, %v2187_v36  ;;  %v2169_v42 = vld [vmem:[%s4156_s25 + $0x28] sm:$0xf] }
  0x38   :  { %524 = vmatpush.bf16.msrb.mxu0 %v2250_v53  ;;  %v2784_v43 = vld [vmem:[%s4156_s25 + $0x34] sm:$0xf0]  ;;  %v2297_v44 = vld [vmem:[%s4156_s25 + $0x128] sm:$0xf]  ;;  %v2318_v45 = vor.u32 %v2818_v37, %v2315_v38  ;;  %v2782_v47 = vld [vmem:[%s4156_s25 + $0x2c] sm:$0xf] }
  0x39   :  { %537 = vmatpush.bf16.msrb.mxu1 %v2378_v56  ;;  %550 = vmatpush.bf16.msrb.mxu2 %v2254_v57  ;;  %v2816_v46 = vld [vmem:[%s4156_s25 + $0x134] sm:$0xf0]  ;;  %v2171_v48 = vld [vmem:[%s4156_s25 + $0x38] sm:$0xf0]  ;;  %v2814_v49 = vld [vmem:[%s4156_s25 + $0x12c] sm:$0xf]  ;;  %v2170_v51 = vor.u32 %v2784_v43, %v2169_v42 }
  0x3a   :  { %563 = vmatpush.bf16.msrb.mxu3 %v2382_v61  ;;  %v2299_v50 = vld [vmem:[%s4156_s25 + $0x138] sm:$0xf0]  ;;  %v2298_v52 = vor.u32 %v2816_v46, %v2297_v44  ;;  %v2174_v53 = vor.u32 %v2782_v47, %v2171_v48  ;;  %v2153_v54 = vld [vmem:[%s4156_s25 + $0x8] sm:$0xf]  ;;  %v2780_v55 = vld [vmem:[%s4156_s25 + $0x14] sm:$0xf0] }
  0x3b   :  { %v2281_v56 = vld [vmem:[%s4156_s25 + $0x108] sm:$0xf]  ;;  %v2302_v57 = vor.u32 %v2814_v49, %v2299_v50  ;;  %v2812_v60 = vld [vmem:[%s4156_s25 + $0x114] sm:$0xf0]  ;;  %v2778_v61 = vld [vmem:[%s4156_s25 + $0xc] sm:$0xf]  ;;  %v2154_v1 = vor.u32 %v2780_v55, %v2153_v54 }
  0x3c   :  { %525 = vmatpush.bf16.msrb.mxu0 %v2234_v3  ;;  %v2155_v62 = vld [vmem:[%s4156_s25 + $0x18] sm:$0xf0]  ;;  %v2810_v63 = vld [vmem:[%s4156_s25 + $0x10c] sm:$0xf]  ;;  %v2282_v2 = vor.u32 %v2812_v60, %v2281_v56  ;;  %v659_v7 = vld [vmem:[%s4158_s5 + $0x70] sm:$0xff] }
  0x3d   :  { %538 = vmatpush.bf16.msrb.mxu1 %v2362_v4  ;;  %551 = vmatpush.bf16.msrb.mxu2 %v2238_v5  ;;  %v2283_v0 = vld [vmem:[%s4156_s25 + $0x118] sm:$0xf0]  ;;  %v2158_v3 = vor.u32 %v2778_v61, %v2155_v62  ;;  %v675_v8 = vld [vmem:[%s4158_s5 + $0xf0] sm:$0xff]  ;;  %v674_v10 = vld [vmem:[%s4158_s5 + $0xe8] sm:$0xff] }
  0x3e   :  { %564 = vmatpush.bf16.msrb.mxu3 %v2366_v9  ;;  %v2286_v4 = vor.u32 %v2810_v63, %v2283_v0  ;;  %v660_v5 = vld [vmem:[%s4158_s5 + $0x78] sm:$0xff]  ;;  %v658_v9 = vld [vmem:[%s4158_s5 + $0x68] sm:$0xff]  ;;  %v657_v11 = vld [vmem:[%s4158_s5 + $0x60] sm:$0xff] }
  0x3f   :  { %v676_v6 = vld [vmem:[%s4158_s5 + $0xf8] sm:$0xff]  ;;  %v655_v13 = vld [vmem:[%s4158_s5 + $0x50] sm:$0xff]  ;;  %v669_v18 = vld [vmem:[%s4158_s5 + $0xc0] sm:$0xff] }
  0x40   :  { %526 = vmatpush.bf16.msrb.mxu0 %v2218_v15  ;;  %v672_v12 = vld [vmem:[%s4158_s5 + $0xd8] sm:$0xff]  ;;  %v671_v14 = vld [vmem:[%s4158_s5 + $0xd0] sm:$0xff]  ;;  %v654_v15 = vld [vmem:[%s4158_s5 + $0x48] sm:$0xff] }
  0x41   :  { %539 = vmatpush.bf16.msrb.mxu1 %v2346_v16  ;;  %552 = vmatpush.bf16.msrb.mxu2 %v2222_v17  ;;  %v670_v16 = vld [vmem:[%s4158_s5 + $0xc8] sm:$0xff]  ;;  %v653_v17 = vld [vmem:[%s4158_s5 + $0x40] sm:$0xff]  ;;  %v652_v19 = vld [vmem:[%s4158_s5 + $0x38] sm:$0xff] }
  0x42   :  { %565 = vmatpush.bf16.msrb.mxu3 %v2350_v21  ;;  %v668_v20 = vld [vmem:[%s4158_s5 + $0xb8] sm:$0xff]  ;;  %v651_v21 = vld [vmem:[%s4158_s5 + $0x30] sm:$0xff]  ;;  %v650_v23 = vld [vmem:[%s4158_s5 + $0x28] sm:$0xff] }
  0x43   :  { %v667_v22 = vld [vmem:[%s4158_s5 + $0xb0] sm:$0xff]  ;;  %v666_v24 = vld [vmem:[%s4158_s5 + $0xa8] sm:$0xff]  ;;  %v692_v25 = vld [vmem:[%s4158_s5 + $0x178] sm:$0xff] }
  0x44   :  { %527 = vmatpush.bf16.msrb.mxu0 %v2202_v27  ;;  %v649_v26 = vld [vmem:[%s4158_s5 + $0x20] sm:$0xff]  ;;  %v691_v28 = vld [vmem:[%s4158_s5 + $0x170] sm:$0xff]  ;;  %v664_v31 = vld [vmem:[%s4158_s5 + $0x98] sm:$0xff] }
  0x45   :  { %540 = vmatpush.bf16.msrb.mxu1 %v2330_v29  ;;  %553 = vmatpush.bf16.msrb.mxu2 %v2206_v30  ;;  %v665_v27 = vld [vmem:[%s4158_s5 + $0xa0] sm:$0xff]  ;;  %v690_v29 = vld [vmem:[%s4158_s5 + $0x168] sm:$0xff]  ;;  %v648_v30 = vld [vmem:[%s4158_s5 + $0x18] sm:$0xff] }
  0x46   :  { %566 = vmatpush.bf16.msrb.mxu3 %v2334_v34  ;;  %v689_v32 = vld [vmem:[%s4158_s5 + $0x160] sm:$0xff]  ;;  %v708_v33 = vld [vmem:[%s4158_s5 + $0x1f8] sm:$0xff]  ;;  %v647_v34 = vld [vmem:[%s4158_s5 + $0x10] sm:$0xff] }
  0x47   :  { %v663_v35 = vld [vmem:[%s4158_s5 + $0x90] sm:$0xff]  ;;  %v688_v37 = vld [vmem:[%s4158_s5 + $0x158] sm:$0xff]  ;;  %v646_v38 = vld [vmem:[%s4158_s5 + $0x8] sm:$0xff] }
  0x48   :  { %528 = vmatpush.bf16.msrb.mxu0 %v2186_v39  ;;  %v707_v36 = vld [vmem:[%s4158_s5 + $0x1f0] sm:$0xff]  ;;  %v662_v39 = vld [vmem:[%s4158_s5 + $0x88] sm:$0xff]  ;;  %v685_v48 = vld [vmem:[%s4158_s5 + $0x140] sm:$0xff] }
  0x49   :  { %541 = vmatpush.bf16.msrb.mxu1 %v2314_v40  ;;  %554 = vmatpush.bf16.msrb.mxu2 %v2190_v41  ;;  %v645_v40 = vld [vmem:[%s4158_s5] sm:$0xff]  ;;  %v687_v42 = vld [vmem:[%s4158_s5 + $0x150] sm:$0xff]  ;;  %v706_v43 = vld [vmem:[%s4158_s5 + $0x1e8] sm:$0xff] }
  0x4a   :  { %567 = vmatpush.bf16.msrb.mxu3 %v2318_v45  ;;  %v661_v41 = vld [vmem:[%s4158_s5 + $0x80] sm:$0xff]  ;;  %v686_v44 = vld [vmem:[%s4158_s5 + $0x148] sm:$0xff]  ;;  %v704_v49 = vld [vmem:[%s4158_s5 + $0x1d8] sm:$0xff] }
  0x4b   :  { %v705_v45 = vld [vmem:[%s4158_s5 + $0x1e0] sm:$0xff]  ;;  %v683_v55 = vld [vmem:[%s4158_s5 + $0x130] sm:$0xff]  ;;  %v702_v56 = vld [vmem:[%s4158_s5 + $0x1c8] sm:$0xff] }
  0x4c   :  { %529 = vmatpush.bf16.msrb.mxu0 %v2170_v51  ;;  %v684_v51 = vld [vmem:[%s4158_s5 + $0x138] sm:$0xff]  ;;  %v682_v0 = vld [vmem:[%s4158_s5 + $0x128] sm:$0xff] }
  0x4d   :  { %542 = vmatpush.bf16.msrb.mxu1 %v2298_v52  ;;  %555 = vmatpush.bf16.msrb.mxu2 %v2174_v53  ;;  %v703_v52 = vld [vmem:[%s4158_s5 + $0x1d0] sm:$0xff] }
  0x4e   :  { %568 = vmatpush.bf16.msrb.mxu3 %v2302_v57 }
  0x50   :  { %530 = vmatpush.bf16.msrb.mxu0 %v2154_v1  ;;  %v701_v1 = vld [vmem:[%s4158_s5 + $0x1c0] sm:$0xff] }
  0x51   :  { %543 = vmatpush.bf16.msrb.mxu1 %v2282_v2  ;;  %556 = vmatpush.bf16.msrb.mxu2 %v2158_v3 }
  0x52   :  { %569 = vmatpush.bf16.msrb.mxu3 %v2286_v4 }
  0x53   :  { %531 = vmatmul.bf16.vlgmr.msrb.gmra.mxu0 %v3356_v58 }
  0x54   :  { %709 = vmatpush.msra.mxu0 %v660_v5  ;;  %544 = vmatmul.bf16.vlgmr.msrb.gmra.mxu1 %v3358_v59 }
  0x55   :  { %729 = vmatpush.msra.mxu1 %v676_v6  ;;  %557 = vmatmul.bf16.vlgmr.msrb.gmra.mxu2 %v3356_v58  ;;  %v673_v58 = vld [vmem:[%s4158_s5 + $0xe0] sm:$0xff] }
  0x56   :  { %570 = vmatmul.bf16.vlgmr.msrb.gmra.mxu3 %v3358_v59  ;;  %710 = vmatpush.msra.mxu0 %v659_v7  ;;  %v656_v59 = vld [vmem:[%s4158_s5 + $0x58] sm:$0xff] }
  0x57   :  { %730 = vmatpush.msra.mxu1 %v675_v8  ;;  %749 = vmatpush.msra.mxu2 %v692_v25  ;;  %v681_v8 = vld [vmem:[%s4158_s5 + $0x120] sm:$0xff] }
  0x58   :  { %711 = vmatpush.msra.mxu0 %v658_v9  ;;  %769 = vmatpush.msra.mxu3 %v708_v33  ;;  %v700_v9 = vld [vmem:[%s4158_s5 + $0x1b8] sm:$0xff] }
  0x59   :  { %731 = vmatpush.msra.mxu1 %v674_v10  ;;  %750 = vmatpush.msra.mxu2 %v691_v28 }
  0x5a   :  { %712 = vmatpush.msra.mxu0 %v657_v11  ;;  %770 = vmatpush.msra.mxu3 %v707_v36  ;;  %v695_v36 = vld [vmem:[%s4158_s5 + $0x190] sm:$0xff] }
  0x5b   :  { %732 = vmatpush.msra.mxu1 %v673_v58  ;;  %751 = vmatpush.msra.mxu2 %v690_v29 }
  0x5c   :  { %713 = vmatpush.msra.mxu0 %v656_v59  ;;  %771 = vmatpush.msra.mxu3 %v706_v43 }
  0x5d   :  { %733 = vmatpush.msra.mxu1 %v672_v12  ;;  %752 = vmatpush.msra.mxu2 %v689_v32  ;;  %v680_v12 = vld [vmem:[%s4158_s5 + $0x118] sm:$0xff] }
  0x5e   :  { %714 = vmatpush.msra.mxu0 %v655_v13  ;;  %772 = vmatpush.msra.mxu3 %v705_v45  ;;  %v699_v13 = vld [vmem:[%s4158_s5 + $0x1b0] sm:$0xff] }
  0x5f   :  { %734 = vmatpush.msra.mxu1 %v671_v14  ;;  %753 = vmatpush.msra.mxu2 %v688_v37 }
  0x60   :  { %715 = vmatpush.msra.mxu0 %v654_v15  ;;  %773 = vmatpush.msra.mxu3 %v704_v49 }
  0x61   :  { %735 = vmatpush.msra.mxu1 %v670_v16  ;;  %754 = vmatpush.msra.mxu2 %v687_v42 }
  0x62   :  { %716 = vmatpush.msra.mxu0 %v653_v17  ;;  %774 = vmatpush.msra.mxu3 %v703_v52 }
  0x63   :  { %736 = vmatpush.msra.mxu1 %v669_v18  ;;  %755 = vmatpush.msra.mxu2 %v686_v44  ;;  %v693_v44 = vld [vmem:[%s4158_s5 + $0x180] sm:$0xff] }
  0x64   :  { %717 = vmatpush.msra.mxu0 %v652_v19  ;;  %775 = vmatpush.msra.mxu3 %v702_v56  ;;  %v679_v19 = vld [vmem:[%s4158_s5 + $0x110] sm:$0xff] }
  0x65   :  { %737 = vmatpush.msra.mxu1 %v668_v20  ;;  %756 = vmatpush.msra.mxu2 %v685_v48  ;;  %v698_v20 = vld [vmem:[%s4158_s5 + $0x1a8] sm:$0xff] }
  0x66   :  { %718 = vmatpush.msra.mxu0 %v651_v21  ;;  %776 = vmatpush.msra.mxu3 %v701_v1 }
  0x67   :  { %738 = vmatpush.msra.mxu1 %v667_v22  ;;  %757 = vmatpush.msra.mxu2 %v684_v51 }
  0x68   :  { %719 = vmatpush.msra.mxu0 %v650_v23  ;;  %777 = vmatpush.msra.mxu3 %v700_v9 }
  0x69   :  { %739 = vmatpush.msra.mxu1 %v666_v24  ;;  %758 = vmatpush.msra.mxu2 %v683_v55 }
  0x6a   :  { %720 = vmatpush.msra.mxu0 %v649_v26  ;;  %778 = vmatpush.msra.mxu3 %v699_v13  ;;  %v678_v26 = vld [vmem:[%s4158_s5 + $0x108] sm:$0xff] }
  0x6b   :  { %740 = vmatpush.msra.mxu1 %v665_v27  ;;  %759 = vmatpush.msra.mxu2 %v682_v0  ;;  %v697_v27 = vld [vmem:[%s4158_s5 + $0x1a0] sm:$0xff] }
  0x6c   :  { %721 = vmatpush.msra.mxu0 %v648_v30  ;;  %779 = vmatpush.msra.mxu3 %v698_v20  ;;  %v677_v30 = vld [vmem:[%s4158_s5 + $0x100] sm:$0xff] }
  0x6d   :  { %741 = vmatpush.msra.mxu1 %v664_v31  ;;  %760 = vmatpush.msra.mxu2 %v681_v8  ;;  %v696_v31 = vld [vmem:[%s4158_s5 + $0x198] sm:$0xff] }
  0x6e   :  { %722 = vmatpush.msra.mxu0 %v647_v34  ;;  %780 = vmatpush.msra.mxu3 %v697_v27 }
  0x6f   :  { %742 = vmatpush.msra.mxu1 %v663_v35  ;;  %761 = vmatpush.msra.mxu2 %v680_v12 }
  0x70   :  { %723 = vmatpush.msra.mxu0 %v646_v38  ;;  %781 = vmatpush.msra.mxu3 %v696_v31 }
  0x71   :  { %743 = vmatpush.msra.mxu1 %v662_v39  ;;  %762 = vmatpush.msra.mxu2 %v679_v19 }
  0x72   :  { %724 = vmatpush.msra.mxu0 %v645_v40  ;;  %v694_v40 = vld [vmem:[%s4158_s5 + $0x188] sm:$0xff]  ;;  %782 = vmatpush.msra.mxu3 %v695_v36 }
  0x73   :  { %744 = vmatpush.msra.mxu1 %v661_v41  ;;  %763 = vmatpush.msra.mxu2 %v678_v26 }
  0x74   :  { %783 = vmatpush.msra.mxu3 %v694_v40  ;;  %v819_v40 = vld [vmem:[%s4159_s22] sm:$0xff] }
  0x75   :  { %764 = vmatpush.msra.mxu2 %v677_v30 }
  0x76   :  { %784 = vmatpush.msra.mxu3 %v693_v44  ;;  %v821_v44 = vld [vmem:[%s4159_s22 + $0x10] sm:$0xff] }
  0x77   :  { %842 = vmatpush.msrb.mxu2 %v819_v40  ;;  %v812_v40 = vld [vmem:[%s4133_s4 + $0x1] sm:$0x1] }
  0xb0   :  { %v480_v46 = vpop.f32.mrf.mxu0 }
  0xb3   :  { %v493_v47 = vpop.f32.mrf.mxu1 }
  0xb4   :  { %v494_v50 = vadd.f32 %v493_v47, %v480_v46 }
  0xb6   :  { %v3647_v53 = vmax.f32 %v494_v50, 0.0 }
  0xb7   :  { %v506_v54 = vpop.f32.mrf.mxu2 }
  0xb8   :  { %v579_v57 = vmul.f32 %v3647_v53, %v3647_v53  ;;  %v584_v60 = vsel %vm583_vm0, %v3647_v53, 0.0  ;;  %v482_v3 = vpop.f32.mrf.mxu0 }
  0xb9   :  { %v585_v62 = vrot.slane %v584_v60, 4 }
  0xba   :  { %v519_v61 = vpop.f32.mrf.mxu3  ;;  %v612_v2 = vsel %vm583_vm0, %v579_v57, 0.0 }
  0xbb   :  { %v520_v63 = vadd.f32 %v519_v61, %v506_v54  ;;  %v586_v4 = vadd.f32 %v585_v62, %v584_v60  ;;  %v613_v5 = vrot.slane %v612_v2, 4  ;;  %v495_v7 = vpop.f32.mrf.mxu1 }
  0xbd   :  { %v3666_v6 = vmax.f32 %v520_v63, 0.0  ;;  %v587_v10 = vrot.slane %v586_v4, 2  ;;  %v614_v11 = vadd.f32 %v613_v5, %v612_v2 }
  0xbf   :  { %v580_v58 = vmul.f32 %v3666_v6, %v3666_v6  ;;  %v591_v59 = vsel %vm583_vm0, %v3666_v6, 0.0  ;;  %v588_v15 = vadd.f32 %v587_v10, %v586_v4  ;;  %v615_v16 = vrot.slane %v614_v11, 2  ;;  %v508_v18 = vpop.f32.mrf.mxu2 }
  0xc0   :  { %v592_v14 = vrot.slane %v591_v59, 4 }
  0xc1   :  { %v619_v17 = vsel %vm583_vm0, %v580_v58, 0.0  ;;  %v589_v24 = vrot.slane %v588_v15, 1  ;;  %v616_v25 = vadd.f32 %v615_v16, %v614_v11 }
  0xc2   :  { %v593_v21 = vadd.f32 %v592_v14, %v591_v59  ;;  %v620_v22 = vrot.slane %v619_v17, 4  ;;  %v521_v23 = vpop.f32.mrf.mxu3 }
  0xc3   :  { %v590_v32 = vadd.f32 %v589_v24, %v588_v15  ;;  %v617_v33 = vrot.slane %v616_v25, 1 }
  0xc4   :  { %v594_v28 = vrot.slane %v593_v21, 2  ;;  %v621_v29 = vadd.f32 %v620_v22, %v619_v17 }
  0xc5   :  { %v618_v37 = vadd.f32 %v617_v33, %v616_v25 }
  0xc6   :  { %v595_v34 = vadd.f32 %v594_v28, %v593_v21  ;;  %v622_v35 = vrot.slane %v621_v29, 2 }
  0xc7   :  { %v641_v41 = vsel %vm640_vm1, %v590_v32, %v618_v37 }
  0xc8   :  { %v596_v38 = vrot.slane %v595_v34, 1  ;;  %v623_v39 = vadd.f32 %v622_v35, %v621_v29  ;;  %725 = vmatmul.f32.vlgmr.msra.gmra.mxu0 %v641_v41  ;;  %v820_v41 = vld [vmem:[%s4159_s22 + $0x8] sm:$0xff] }
  0xc9   :  { %862 = vmatpush.msrb.mxu1 %v820_v41  ;;  %v2485_v41 = vld [vmem:[#allocation2 + $0xa0] sm:$0xf] }
  0xca   :  { %v597_v42 = vadd.f32 %v596_v38, %v595_v34  ;;  %v624_v43 = vrot.slane %v623_v39, 1 }
  0xcc   :  { %v625_v45 = vadd.f32 %v624_v43, %v623_v39 }
  0xce   :  { %v642_v46 = vsel %vm640_vm1, %v597_v42, %v625_v45  ;;  %v822_v42 = vld [vmem:[%s4159_s22 + $0x18] sm:$0xff] }
  0xcf   :  { %745 = vmatmul.f32.vlgmr.msra.gmra.mxu1 %v642_v46  ;;  %902 = vmatpush.msrb.mxu3 %v822_v42  ;;  %v2525_v46 = vld [vmem:[#allocation2 + $0xf0] sm:$0xf]  ;;  %v2862_v42 = vld [vmem:[#allocation2 + $0xa4] sm:$0xf0] }
  0xd0   :  { %v532_v47 = vpop.f32.mrf.mxu0 }
  0xd1   :  { %v545_v48 = vpop.f32.mrf.mxu1 }
  0xd2   :  { %v546_v49 = vadd.f32 %v545_v48, %v532_v47  ;;  %v2872_v47 = vld [vmem:[#allocation2 + $0xf4] sm:$0xf0]  ;;  %v2517_v48 = vld [vmem:[#allocation2 + $0xe0] sm:$0xf] }
  0xd4   :  { %v3714_v50 = vmax.f32 %v546_v49, 0.0 }
  0xd6   :  { %v581_v51 = vmul.f32 %v3714_v50, %v3714_v50  ;;  %v598_v52 = vsel %vm583_vm0, %v3714_v50, 0.0 }
  0xd7   :  { %v599_v54 = vrot.slane %v598_v52, 4 }
  0xd8   :  { %v558_v55 = vpop.f32.mrf.mxu2  ;;  %v626_v56 = vsel %vm583_vm0, %v581_v51, 0.0  ;;  %v534_v60 = vpop.f32.mrf.mxu0  ;;  %v2526_v51 = vor.u32 %v2872_v47, %v2525_v46  ;;  %v2589_v46 = vld [vmem:[#allocation2 + $0x170] sm:$0xf]  ;;  %v2888_v47 = vld [vmem:[#allocation2 + $0x174] sm:$0xf0] }
  0xd9   :  { %v571_v57 = vpop.f32.mrf.mxu3  ;;  %v600_v61 = vadd.f32 %v599_v54, %v598_v52  ;;  %v627_v62 = vrot.slane %v626_v56, 4  ;;  %v547_v0 = vpop.f32.mrf.mxu1  ;;  %v2870_v52 = vld [vmem:[#allocation2 + $0xe4] sm:$0xf0]  ;;  %v2461_v54 = vld [vmem:[#allocation2 + $0x70] sm:$0xf] }
  0xda   :  { %v572_v63 = vadd.f32 %v571_v57, %v558_v55  ;;  %v2856_v55 = vld [vmem:[#allocation2 + $0x74] sm:$0xf0]  ;;  %v2653_v60 = vld [vmem:[#allocation2 + $0x1f0] sm:$0xf]  ;;  %1324 = vmatpush.bf16.msra.mxu1 %v2526_v51  ;;  %v2486_v51 = vor.u32 %v2862_v42, %v2485_v41  ;;  %v2655_v42 = vld [vmem:[#allocation2 + $0x1f8] sm:$0xf0] }
  0xdb   :  { %v601_v1 = vrot.slane %v600_v61, 2  ;;  %v628_v2 = vadd.f32 %v627_v62, %v626_v56  ;;  %v2462_v57 = vor.u32 %v2856_v55, %v2461_v54  ;;  %v2518_v62 = vor.u32 %v2870_v52, %v2517_v48  ;;  %v2509_v0 = vld [vmem:[#allocation2 + $0xd0] sm:$0xf]  ;;  %v2421_v48 = vld [vmem:[#allocation2 + $0x20] sm:$0xf] }
  0xdc   :  { %v3721_v3 = vmax.f32 %v572_v63, 0.0  ;;  %v2846_v52 = vld [vmem:[#allocation2 + $0x24] sm:$0xf0]  ;;  %v2613_v54 = vld [vmem:[#allocation2 + $0x1a0] sm:$0xf] }
  0xdd   :  { %v602_v4 = vadd.f32 %v601_v1, %v600_v61  ;;  %v629_v5 = vrot.slane %v628_v2, 2  ;;  %v2904_v61 = vld [vmem:[#allocation2 + $0x1f4] sm:$0xf0]  ;;  %1311 = vmatpush.bf16.msrb.mxu0 %v2462_v57  ;;  %v2894_v55 = vld [vmem:[#allocation2 + $0x1a4] sm:$0xf0] }
  0xde   :  { %v582_v7 = vmul.f32 %v3721_v3, %v3721_v3  ;;  %v605_v8 = vsel %vm583_vm0, %v3721_v3, 0.0  ;;  %v2654_v63 = vor.u32 %v2904_v61, %v2653_v60  ;;  %v2868_v1 = vld [vmem:[#allocation2 + $0xd4] sm:$0xf0]  ;;  %1325 = vmatpush.bf16.msra.mxu1 %v2518_v62  ;;  %v2590_v61 = vor.u32 %v2888_v47, %v2589_v46  ;;  %v2581_v62 = vld [vmem:[#allocation2 + $0x160] sm:$0xf] }
  0xdf   :  { %v606_v9 = vrot.slane %v605_v8, 4  ;;  %v603_v58 = vrot.slane %v602_v4, 1  ;;  %v630_v59 = vadd.f32 %v629_v5, %v628_v2  ;;  %v2453_v2 = vld [vmem:[#allocation2 + $0x60] sm:$0xf]  ;;  %v2854_v5 = vld [vmem:[#allocation2 + $0x64] sm:$0xf0] }
  0xe0   :  { %v633_v10 = vsel %vm583_vm0, %v582_v7, 0.0  ;;  %v560_v11 = vpop.f32.mrf.mxu2  ;;  %v2645_v7 = vld [vmem:[#allocation2 + $0x1e0] sm:$0xf]  ;;  %v2860_v57 = vld [vmem:[#allocation2 + $0x94] sm:$0xf0] }
  0xe1   :  { %v607_v12 = vadd.f32 %v606_v9, %v605_v8  ;;  %v634_v13 = vrot.slane %v633_v10, 4  ;;  %v573_v14 = vpop.f32.mrf.mxu3  ;;  %v631_v15 = vrot.slane %v630_v59, 1  ;;  %v604_v18 = vadd.f32 %v603_v58, %v602_v4  ;;  %v2902_v8 = vld [vmem:[#allocation2 + $0x1e4] sm:$0xf0]  ;;  %v2445_v11 = vld [vmem:[#allocation2 + $0x50] sm:$0xf] }
  0xe2   :  { %v2454_v9 = vor.u32 %v2854_v5, %v2453_v2  ;;  %v2900_v14 = vld [vmem:[#allocation2 + $0x1d4] sm:$0xf0]  ;;  %v2541_v47 = vld [vmem:[#allocation2 + $0x110] sm:$0xf] }
  0xe3   :  { %v608_v16 = vrot.slane %v607_v12, 2  ;;  %v635_v17 = vadd.f32 %v634_v13, %v633_v10  ;;  %v632_v19 = vadd.f32 %v631_v15, %v630_v59  ;;  %v2646_v10 = vor.u32 %v2902_v8, %v2645_v7  ;;  %v2852_v59 = vld [vmem:[#allocation2 + $0x54] sm:$0xf0]  ;;  %v2637_v13 = vld [vmem:[#allocation2 + $0x1d0] sm:$0xf] }
  0xe4   :  { %1312 = vmatpush.bf16.msrb.mxu0 %v2454_v9  ;;  %v2844_v5 = vld [vmem:[#allocation2 + $0x14] sm:$0xf0]  ;;  %v2605_v7 = vld [vmem:[#allocation2 + $0x190] sm:$0xf]  ;;  %v2469_v9 = vld [vmem:[#allocation2 + $0x80] sm:$0xf] }
  0xe5   :  { %v609_v20 = vadd.f32 %v608_v16, %v607_v12  ;;  %v636_v21 = vrot.slane %v635_v17, 2  ;;  %v643_v22 = vsel %vm640_vm1, %v604_v18, %v632_v19  ;;  %v2510_v12 = vor.u32 %v2868_v1, %v2509_v0  ;;  %v2501_v16 = vld [vmem:[#allocation2 + $0xc0] sm:$0xf]  ;;  %v2413_v1 = vld [vmem:[#allocation2 + $0x10] sm:$0xf] }
  0xe6   :  { %765 = vmatmul.f32.vlgmr.msra.gmra.mxu2 %v643_v22  ;;  %v2446_v18 = vor.u32 %v2852_v59, %v2445_v11  ;;  %v2638_v19 = vor.u32 %v2900_v14, %v2637_v13  ;;  %v2614_v0 = vor.u32 %v2894_v55, %v2613_v54  ;;  %v2892_v8 = vld [vmem:[#allocation2 + $0x194] sm:$0xf0]  ;;  %v2527_v59 = vld [vmem:[#allocation2 + $0xf8] sm:$0xf0]  ;;  %v2414_v14 = vor.u32 %v2844_v5, %v2413_v1  ;;  %v2901_v54 = vld [vmem:[#allocation2 + $0x1e4] sm:$0xf] }
  0xe7   :  { %v610_v23 = vrot.slane %v609_v20, 1  ;;  %v637_v24 = vadd.f32 %v636_v21, %v635_v17  ;;  %882 = vmatpush.msra.mxu2 %v821_v44  ;;  %v2866_v17 = vld [vmem:[#allocation2 + $0xc4] sm:$0xf0]  ;;  %1326 = vmatpush.bf16.msra.mxu1 %v2510_v12  ;;  %v2573_v12 = vld [vmem:[#allocation2 + $0x150] sm:$0xf] }
  0xe8   :  { %v2850_v21 = vld [vmem:[#allocation2 + $0x44] sm:$0xf0]  ;;  %1313 = vmatpush.bf16.msrb.mxu0 %v2446_v18  ;;  %v2884_v13 = vld [vmem:[#allocation2 + $0x154] sm:$0xf0]  ;;  %v2851_v1 = vld [vmem:[#allocation2 + $0x54] sm:$0xf] }
  0xe9   :  { %v638_v25 = vrot.slane %v637_v24, 1  ;;  %v611_v26 = vadd.f32 %v610_v23, %v609_v20  ;;  %v2437_v20 = vld [vmem:[#allocation2 + $0x40] sm:$0xf]  ;;  %v2842_v18 = vld [vmem:[#allocation2 + $0x4] sm:$0xf0] }
  0xea   :  { %v2629_v23 = vld [vmem:[#allocation2 + $0x1c0] sm:$0xf] }
  0xeb   :  { %v639_v27 = vadd.f32 %v638_v25, %v637_v24  ;;  %v2898_v24 = vld [vmem:[#allocation2 + $0x1c4] sm:$0xf0]  ;;  %v2502_v25 = vor.u32 %v2866_v17, %v2501_v16  ;;  %v2405_v16 = vld [vmem:[#allocation2] sm:$0xf] }
  0xed   :  { %v644_v28 = vsel %vm640_vm1, %v611_v26, %v639_v27  ;;  %v796_v26 = vld [vmem:[%s4133_s4] sm:$0x1]  ;;  %1327 = vmatpush.bf16.msra.mxu1 %v2502_v25  ;;  %v2565_v25 = vld [vmem:[#allocation2 + $0x140] sm:$0xf] }
  0xee   :  { %785 = vmatmul.f32.vlgmr.msra.gmra.mxu3 %v644_v28  ;;  %v2493_v28 = vld [vmem:[#allocation2 + $0xb0] sm:$0xf] }
  0xef   :  { %1350 = vmatpush.bf16.msra.mxu3 %v2654_v63  ;;  %v2422_v63 = vor.u32 %v2846_v52, %v2421_v48  ;;  %v2876_v48 = vld [vmem:[#allocation2 + $0x114] sm:$0xf0]  ;;  %v2455_v52 = vld [vmem:[#allocation2 + $0x68] sm:$0xf0] }
  0xf3   :  { %1351 = vmatpush.bf16.msra.mxu3 %v2646_v10  ;;  %v2858_v10 = vld [vmem:[#allocation2 + $0x84] sm:$0xf0] }
  0xf4   :  { %v2470_v17 = vor.u32 %v2858_v10, %v2469_v9  ;;  %v2639_v9 = vld [vmem:[#allocation2 + $0x1d8] sm:$0xf0] }
  0xf7   :  { %1352 = vmatpush.bf16.msra.mxu3 %v2638_v19  ;;  %v2597_v19 = vld [vmem:[#allocation2 + $0x180] sm:$0xf] }
 0x145   :  { %v726_v29 = vpop.f32.mrf.mxu0 }
 0x14c   :  { %v746_v30 = vpop.f32.mrf.mxu1 }
 0x14d   :  { %v747_v32 = vadd.f32 %v746_v30, %v726_v29  ;;  %v2864_v29 = vld [vmem:[#allocation2 + $0xb4] sm:$0xf0]  ;;  %v2438_v30 = vor.u32 %v2850_v21, %v2437_v20  ;;  %v2890_v20 = vld [vmem:[#allocation2 + $0x184] sm:$0xf0] }
 0x14f   :  { %1314 = vmatpush.bf16.msrb.mxu0 %v2438_v30 }
 0x169   :  { %v766_v31 = vpop.f32.mrf.mxu2 }
 0x16a   :  { %v767_v33 = vadd.f32 %v766_v31, %v747_v32  ;;  %v2630_v32 = vor.u32 %v2898_v24, %v2629_v23  ;;  %v2869_v23 = vld [vmem:[#allocation2 + $0xe4] sm:$0xf]  ;;  %v2519_v24 = vld [vmem:[#allocation2 + $0xe8] sm:$0xf0] }
 0x16c   :  { %1353 = vmatpush.bf16.msra.mxu3 %v2630_v32  ;;  %v2880_v32 = vld [vmem:[#allocation2 + $0x134] sm:$0xf0] }
 0x171   :  { %v786_v34 = vpop.f32.mrf.mxu3 }
 0x172   :  { %v787_v35 = vadd.f32 %v786_v34, %v767_v33  ;;  %v2429_v33 = vld [vmem:[#allocation2 + $0x30] sm:$0xf]  ;;  %v2848_v34 = vld [vmem:[#allocation2 + $0x34] sm:$0xf0] }
 0x174   :  { %v3730_v36 = vmul.f32 0.0078125, %v787_v35  ;;  %v2621_v35 = vld [vmem:[#allocation2 + $0x1b0] sm:$0xf] }
 0x176   :  { %v790_v37 = vmul.f32 %v3730_v36, %v3730_v36 }
 0x178   :  { %v792_v38 = vrot.slane %v790_v37, 7  ;;  %v2896_v37 = vld [vmem:[#allocation2 + $0x1b4] sm:$0xf0] }
 0x17a   :  { %v794_v39 = vsub.f32 %v3730_v36, %v792_v38 }
 0x17c   :  { %v795_v43 = vmax.f32 %v794_v39, 0.0  ;;  %v2494_v39 = vor.u32 %v2864_v29, %v2493_v28  ;;  %v2598_v28 = vor.u32 %v2890_v20, %v2597_v19  ;;  %v2522_v29 = vor.u32 %v2869_v23, %v2519_v24  ;;  %v2631_v19 = vld [vmem:[#allocation2 + $0x1c8] sm:$0xf0] }
 0x17d   :  { %v2487_v23 = vld [vmem:[#allocation2 + $0xa8] sm:$0xf0] }
 0x17e   :  { %v797_v45 = vadd.f32 1e-05, %v795_v43  ;;  %v2430_v43 = vor.u32 %v2848_v34, %v2429_v33  ;;  %1328 = vmatpush.bf16.msra.mxu1 %v2494_v39  ;;  %v2549_v34 = vld [vmem:[#allocation2 + $0x120] sm:$0xf]  ;;  %v2463_v39 = vld [vmem:[#allocation2 + $0x78] sm:$0xf0] }
 0x180   :  { %2939 = vrsqrt.f32 %v797_v45  ;;  %vm804_vm3 = vweird.f32 %v797_v45  ;;  %1315 = vmatpush.bf16.msrb.mxu0 %v2430_v43 }
 0x182   :  { %1329 = vmatpush.bf16.msra.mxu1 %v2486_v51  ;;  %v2853_v51 = vld [vmem:[#allocation2 + $0x64] sm:$0xf] }
 0x183   :  { %v2458_v55 = vor.u32 %v2853_v51, %v2455_v52  ;;  %v2843_v51 = vld [vmem:[#allocation2 + $0x14] sm:$0xf]  ;;  %v2415_v52 = vld [vmem:[#allocation2 + $0x18] sm:$0xf0] }
 0x184   :  { %1316 = vmatpush.bf16.msrb.mxu0 %v2422_v63  ;;  %v2874_v63 = vld [vmem:[#allocation2 + $0x104] sm:$0xf0] }
 0x186   :  { %v2940_v49 = vpop.eup %2939 }
 0x187   :  { %v799_v56 = vmul.f32 %v2940_v49, %v797_v45  ;;  %vm805_vm2 = vweird.f32 %v2940_v49  ;;  %v2622_v45 = vor.u32 %v2896_v37, %v2621_v35  ;;  %v2878_v35 = vld [vmem:[#allocation2 + $0x124] sm:$0xf0] }
 0x188   :  { %vm806_vm4 = vmor %vm804_vm3, %vm805_vm2  ;;  %1317 = vmatpush.bf16.msrb.mxu0 %v2414_v14  ;;  %v2550_v37 = vor.u32 %v2878_v35, %v2549_v34  ;;  %v2439_v14 = vld [vmem:[#allocation2 + $0x48] sm:$0xf0]  ;;  %v2859_v34 = vld [vmem:[#allocation2 + $0x94] sm:$0xf] }
 0x189   :  { %v800_v4 = vmul.f32 %v2940_v49, %v799_v56  ;;  %v2477_v56 = vld [vmem:[#allocation2 + $0x90] sm:$0xf]  ;;  %1354 = vmatpush.bf16.msra.mxu3 %v2622_v45  ;;  %v2511_v45 = vld [vmem:[#allocation2 + $0xd8] sm:$0xf0] }
 0x18a   :  { %v2479_v35 = vld [vmem:[#allocation2 + $0x98] sm:$0xf0] }
 0x18b   :  { %v801_v58 = vmul.f32 0.5, %v800_v4  ;;  %v2478_v4 = vor.u32 %v2860_v57, %v2477_v56  ;;  %v2647_v56 = vld [vmem:[#allocation2 + $0x1e8] sm:$0xf0] }
 0x18c   :  { %v2650_v57 = vor.u32 %v2901_v54, %v2647_v56  ;;  %v2879_v54 = vld [vmem:[#allocation2 + $0x134] sm:$0xf]  ;;  %v2559_v56 = vld [vmem:[#allocation2 + $0x138] sm:$0xf0] }
 0x18d   :  { %v802_v15 = vsub.f32 1.5, %v801_v58  ;;  %v2871_v58 = vld [vmem:[#allocation2 + $0xf4] sm:$0xf]  ;;  %1355 = vmatpush.bf16.msra.mxu3 %v2614_v0  ;;  %1330 = vmatpush.bf16.msra.mxu1 %v2478_v4 }
 0x18e   :  { %v2530_v21 = vor.u32 %v2871_v58, %v2527_v59  ;;  %v2887_v4 = vld [vmem:[#allocation2 + $0x174] sm:$0xf]  ;;  %v2495_v59 = vld [vmem:[#allocation2 + $0xb8] sm:$0xf0] }
 0x18f   :  { %v803_v22 = vmul.f32 %v2940_v49, %v802_v15  ;;  %v2606_v15 = vor.u32 %v2892_v8, %v2605_v7  ;;  %v2591_v7 = vld [vmem:[#allocation2 + $0x178] sm:$0xf0]  ;;  %v2899_v8 = vld [vmem:[#allocation2 + $0x1d4] sm:$0xf] }
 0x190   :  { %v2594_v10 = vor.u32 %v2887_v4, %v2591_v7  ;;  %v2863_v58 = vld [vmem:[#allocation2 + $0xb4] sm:$0xf]  ;;  %v2889_v4 = vld [vmem:[#allocation2 + $0x184] sm:$0xf] }
 0x191   :  { %v807_v27 = vsel %vm806_vm4, %v2940_v49, %v803_v22  ;;  %v2574_v22 = vor.u32 %v2884_v13, %v2573_v12  ;;  %1356 = vmatpush.bf16.msra.mxu3 %v2606_v15  ;;  %1331 = vmatpush.bf16.msra.mxu1 %v2470_v17  ;;  %v2498_v12 = vor.u32 %v2863_v58, %v2495_v59  ;;  %v2849_v13 = vld [vmem:[#allocation2 + $0x44] sm:$0xf]  ;;  %v2583_v17 = vld [vmem:[#allocation2 + $0x168] sm:$0xf0] }
 0x192   :  { %v809_v31 = vrot.slane %v807_v27, 1  ;;  %v2406_v27 = vor.u32 %v2842_v18, %v2405_v16  ;;  %v2885_v15 = vld [vmem:[#allocation2 + $0x164] sm:$0xf]  ;;  %v2442_v16 = vor.u32 %v2849_v13, %v2439_v14 }
 0x193   :  { %v2897_v18 = vld [vmem:[#allocation2 + $0x1c4] sm:$0xf]  ;;  %v2586_v20 = vor.u32 %v2885_v15, %v2583_v17 }
 0x194   :  { %v811_v38 = vmul.f32 %v809_v31, %v796_v26  ;;  %v2882_v26 = vld [vmem:[#allocation2 + $0x144] sm:$0xf0]  ;;  %v2557_v31 = vld [vmem:[#allocation2 + $0x130] sm:$0xf]  ;;  %1318 = vmatpush.bf16.msrb.mxu0 %v2406_v27  ;;  %v2883_v27 = vld [vmem:[#allocation2 + $0x154] sm:$0xf] }
 0x195   :  { %v2566_v30 = vor.u32 %v2882_v26, %v2565_v25  ;;  %1357 = vmatpush.bf16.msra.mxu3 %v2598_v28  ;;  %v2558_v33 = vor.u32 %v2880_v32, %v2557_v31  ;;  %v2847_v25 = vld [vmem:[#allocation2 + $0x34] sm:$0xf]  ;;  %v2431_v26 = vld [vmem:[#allocation2 + $0x38] sm:$0xf0]  ;;  %v2873_v59 = vld [vmem:[#allocation2 + $0x104] sm:$0xf] }
 0x196   :  { %v813_v44 = vmul.f32 %v811_v38, %v3730_v36  ;;  %v2886_v36 = vld [vmem:[#allocation2 + $0x164] sm:$0xf0]  ;;  %v2434_v28 = vor.u32 %v2847_v25, %v2431_v26  ;;  %v2623_v31 = vld [vmem:[#allocation2 + $0x1b8] sm:$0xf0] }
 0x197   :  { %v2582_v11 = vor.u32 %v2886_v36, %v2581_v62  ;;  %v2533_v36 = vld [vmem:[#allocation2 + $0x100] sm:$0xf] }
 0x198   :  { %v814_v49 = vsub.f32 %v812_v40, %v813_v44  ;;  %v2903_v40 = vld [vmem:[#allocation2 + $0x1f4] sm:$0xf]  ;;  %v2534_v0 = vor.u32 %v2874_v63, %v2533_v36  ;;  %v2841_v36 = vld [vmem:[#allocation2 + $0x4] sm:$0xf]  ;;  %v2407_v63 = vld [vmem:[#allocation2 + $0x8] sm:$0xf0] }
 0x199   :  { %v2658_v43 = vor.u32 %v2903_v40, %v2655_v42  ;;  %v2867_v44 = vld [vmem:[#allocation2 + $0xd4] sm:$0xf]  ;;  %v2881_v40 = vld [vmem:[#allocation2 + $0x144] sm:$0xf]  ;;  %v2567_v42 = vld [vmem:[#allocation2 + $0x148] sm:$0xf0] }
 0x19a   :  { %v816_v60 = vrot.slane %v814_v49, 7  ;;  %v2514_v46 = vor.u32 %v2867_v44, %v2511_v45  ;;  %v2542_v49 = vor.u32 %v2876_v48, %v2541_v47  ;;  %v2615_v44 = vld [vmem:[#allocation2 + $0x1a8] sm:$0xf0]  ;;  %v2570_v45 = vor.u32 %v2881_v40, %v2567_v42  ;;  %v2857_v47 = vld [vmem:[#allocation2 + $0x84] sm:$0xf]  ;;  %v1456_v42 = vld [vmem:[%s4135_s6 + $0x38] sm:$0xff] }
 0x19b   :  { %v2471_v48 = vld [vmem:[#allocation2 + $0x88] sm:$0xf0]  ;;  %v1458_v40 = vld [vmem:[%s4135_s6 + $0x48] sm:$0xff] }
 0x19c   :  { %v818_v2 = vsel %vm640_vm1, %v811_v38, %v816_v60  ;;  %v2855_v38 = vld [vmem:[#allocation2 + $0x74] sm:$0xf]  ;;  %v2865_v60 = vld [vmem:[#allocation2 + $0xc4] sm:$0xf] }
 0x19d   :  { %2399 = vmatmul.msk.f32.vlgmr.msrb.gmra.mxu2 %vm823_vm5, %v818_v2  ;;  %2400 = vmatmul.msk.f32.vlgmr.msrb.gmra.mxu1 %vm823_vm5, %v818_v2  ;;  %v2466_v41 = vor.u32 %v2855_v38, %v2463_v39  ;;  %v2845_v38 = vld [vmem:[#allocation2 + $0x24] sm:$0xf]  ;;  %v2423_v39 = vld [vmem:[#allocation2 + $0x28] sm:$0xf0] }
 0x19e   :  { %2402 = vmatmul.msk.f32.vlgmr.msrb.gmra.mxu3 %vm823_vm5, %v818_v2  ;;  %1337 = vmatpush.bf16.msrb.mxu2 %v2590_v61  ;;  %v2503_v61 = vld [vmem:[#allocation2 + $0xc8] sm:$0xf0] }
 0x19f   :  { %1376 = vmatpush.bf16.msrb.mxu1 %v2530_v21  ;;  %1363 = vmatpush.bf16.msra.mxu0 %v2466_v41  ;;  %v2506_v62 = vor.u32 %v2865_v60, %v2503_v61  ;;  %v2634_v21 = vor.u32 %v2897_v18, %v2631_v19  ;;  %v2426_v41 = vor.u32 %v2845_v38, %v2423_v39  ;;  %v2607_v60 = vld [vmem:[#allocation2 + $0x198] sm:$0xf0]  ;;  %v1460_v38 = vld [vmem:[%s4135_s6 + $0x58] sm:$0xff]  ;;  %v1459_v39 = vld [vmem:[%s4135_s6 + $0x50] sm:$0xff] }
 0x1a0   :  { %1402 = vmatpush.bf16.msrb.mxu3 %v2658_v43  ;;  %v2893_v43 = vld [vmem:[#allocation2 + $0x1a4] sm:$0xf]  ;;  %v2562_v61 = vor.u32 %v2879_v54, %v2559_v56  ;;  %v1476_v54 = vld [vmem:[%s4135_s6 + $0xd8] sm:$0xff]  ;;  %v1451_v56 = vld [vmem:[%s4135_s6 + $0x10] sm:$0xff] }
 0x1a2   :  { %1338 = vmatpush.bf16.msrb.mxu2 %v2582_v11  ;;  %v2642_v11 = vor.u32 %v2899_v8, %v2639_v9  ;;  %v2875_v9 = vld [vmem:[#allocation2 + $0x114] sm:$0xf] }
 0x1a3   :  { %1377 = vmatpush.bf16.msrb.mxu1 %v2522_v29  ;;  %1364 = vmatpush.bf16.msra.mxu0 %v2458_v55  ;;  %v2575_v29 = vld [vmem:[#allocation2 + $0x158] sm:$0xf0]  ;;  %v2418_v55 = vor.u32 %v2843_v51, %v2415_v52  ;;  %v1452_v52 = vld [vmem:[%s4135_s6 + $0x18] sm:$0xff] }
 0x1a4   :  { %1403 = vmatpush.bf16.msrb.mxu3 %v2650_v57  ;;  %v2578_v32 = vor.u32 %v2883_v27, %v2575_v29  ;;  %v2891_v57 = vld [vmem:[#allocation2 + $0x194] sm:$0xf]  ;;  %v1477_v51 = vld [vmem:[%s4135_s6 + $0xe0] sm:$0xff] }
 0x1a5   :  { %2401 = vmatmul.msk.f32.vlgmr.msra.gmra.mxu2 %vm823_vm5, %v818_v2  ;;  %v2447_v2 = vld [vmem:[#allocation2 + $0x58] sm:$0xf0] }
 0x1a6   :  { %1339 = vmatpush.bf16.msrb.mxu2 %v2574_v22  ;;  %v2450_v5 = vor.u32 %v2851_v1, %v2447_v2  ;;  %v2861_v22 = vld [vmem:[#allocation2 + $0xa4] sm:$0xf]  ;;  %v2410_v1 = vor.u32 %v2841_v36, %v2407_v63  ;;  %v2551_v2 = vld [vmem:[#allocation2 + $0x128] sm:$0xf0]  ;;  %v1449_v36 = vld [vmem:[%s4135_s6] sm:$0xff] }
 0x1a7   :  { %1378 = vmatpush.bf16.msrb.mxu1 %v2514_v46  ;;  %v2490_v24 = vor.u32 %v2861_v22, %v2487_v23  ;;  %v2618_v46 = vor.u32 %v2893_v43, %v2615_v44  ;;  %v1480_v43 = vld [vmem:[%s4135_s6 + $0xf8] sm:$0xff]  ;;  %v1455_v44 = vld [vmem:[%s4135_s6 + $0x30] sm:$0xff]  ;;  %v1473_v63 = vld [vmem:[%s4135_s6 + $0xc0] sm:$0xff] }
 0x1a8   :  { %1365 = vmatpush.bf16.msra.mxu0 %v2450_v5  ;;  %1404 = vmatpush.bf16.msrb.mxu3 %v2642_v11  ;;  %v2599_v5 = vld [vmem:[#allocation2 + $0x188] sm:$0xf0] }
 0x1a9   :  { %v2602_v8 = vor.u32 %v2889_v4, %v2599_v5  ;;  %v1471_v4 = vld [vmem:[%s4135_s6 + $0xb0] sm:$0xff] }
 0x1aa   :  { %1340 = vmatpush.bf16.msrb.mxu2 %v2566_v30  ;;  %v2895_v30 = vld [vmem:[#allocation2 + $0x1b4] sm:$0xf] }
 0x1ab   :  { %1379 = vmatpush.bf16.msrb.mxu1 %v2506_v62  ;;  %v2610_v62 = vor.u32 %v2891_v57, %v2607_v60  ;;  %v1475_v57 = vld [vmem:[%s4135_s6 + $0xd0] sm:$0xff] }
 0x1ac   :  { %1366 = vmatpush.bf16.msra.mxu0 %v2442_v16  ;;  %1405 = vmatpush.bf16.msrb.mxu3 %v2634_v21 }
 0x1ae   :  { %1341 = vmatpush.bf16.msrb.mxu2 %v2558_v33  ;;  %v2626_v33 = vor.u32 %v2895_v30, %v2623_v31 }
 0x1af   :  { %1380 = vmatpush.bf16.msrb.mxu1 %v2498_v12  ;;  %v2535_v12 = vld [vmem:[#allocation2 + $0x108] sm:$0xf0] }
 0x1b0   :  { %1367 = vmatpush.bf16.msra.mxu0 %v2434_v28  ;;  %1406 = vmatpush.bf16.msrb.mxu3 %v2626_v33  ;;  %v2538_v14 = vor.u32 %v2873_v59, %v2535_v12 }
 0x1b2   :  { %1342 = vmatpush.bf16.msrb.mxu2 %v2550_v37  ;;  %v2482_v37 = vor.u32 %v2859_v34, %v2479_v35 }
 0x1b3   :  { %1381 = vmatpush.bf16.msrb.mxu1 %v2490_v24 }
 0x1b4   :  { %1368 = vmatpush.bf16.msra.mxu0 %v2426_v41  ;;  %1407 = vmatpush.bf16.msrb.mxu3 %v2618_v46  ;;  %v1457_v41 = vld [vmem:[%s4135_s6 + $0x40] sm:$0xff] }
 0x1b6   :  { %1343 = vmatpush.bf16.msrb.mxu2 %v2542_v49  ;;  %v2474_v49 = vor.u32 %v2857_v47, %v2471_v48  ;;  %v1454_v47 = vld [vmem:[%s4135_s6 + $0x28] sm:$0xff] }
 0x1b7   :  { %1382 = vmatpush.bf16.msrb.mxu1 %v2482_v37  ;;  %v1461_v37 = vld [vmem:[%s4135_s6 + $0x60] sm:$0xff]  ;;  %v1478_v48 = vld [vmem:[%s4135_s6 + $0xe8] sm:$0xff] }
 0x1b8   :  { %1369 = vmatpush.bf16.msra.mxu0 %v2418_v55  ;;  %1408 = vmatpush.bf16.msrb.mxu3 %v2610_v62  ;;  %v1474_v62 = vld [vmem:[%s4135_s6 + $0xc8] sm:$0xff] }
 0x1ba   :  { %1344 = vmatpush.bf16.msrb.mxu2 %v2534_v0  ;;  %v2877_v0 = vld [vmem:[#allocation2 + $0x124] sm:$0xf] }
 0x1bb   :  { %1383 = vmatpush.bf16.msrb.mxu1 %v2474_v49  ;;  %v2554_v7 = vor.u32 %v2877_v0, %v2551_v2  ;;  %v1453_v49 = vld [vmem:[%s4135_s6 + $0x20] sm:$0xff]  ;;  %v1472_v0 = vld [vmem:[%s4135_s6 + $0xb8] sm:$0xff] }
 0x1bc   :  { %1370 = vmatpush.bf16.msra.mxu0 %v2410_v1  ;;  %1409 = vmatpush.bf16.msrb.mxu3 %v2602_v8  ;;  %v1469_v8 = vld [vmem:[%s4135_s6 + $0xa0] sm:$0xff] }
 0x1be   :  { %1389 = vmatpush.bf16.msra.mxu2 %v2594_v10  ;;  %v2543_v10 = vld [vmem:[#allocation2 + $0x118] sm:$0xf0] }
 0x1bf   :  { %v2546_v11 = vor.u32 %v2875_v9, %v2543_v10  ;;  %v1468_v9 = vld [vmem:[%s4135_s6 + $0x98] sm:$0xff] }
 0x1c2   :  { %1390 = vmatpush.bf16.msra.mxu2 %v2586_v20 }
 0x1c6   :  { %1391 = vmatpush.bf16.msra.mxu2 %v2578_v32 }
 0x1ca   :  { %1392 = vmatpush.bf16.msra.mxu2 %v2570_v45  ;;  %v1479_v45 = vld [vmem:[%s4135_s6 + $0xf0] sm:$0xff] }
 0x1ce   :  { %1393 = vmatpush.bf16.msra.mxu2 %v2562_v61  ;;  %v1450_v61 = vld [vmem:[%s4135_s6 + $0x8] sm:$0xff] }
 0x1d2   :  { %1394 = vmatpush.bf16.msra.mxu2 %v2554_v7  ;;  %v1470_v7 = vld [vmem:[%s4135_s6 + $0xa8] sm:$0xff] }
 0x1d6   :  { %1395 = vmatpush.bf16.msra.mxu2 %v2546_v11 }
 0x1da   :  { %1396 = vmatpush.bf16.msra.mxu2 %v2538_v14  ;;  %v1466_v14 = vld [vmem:[%s4135_s6 + $0x88] sm:$0xff] }
 0x21a   :  { %v864_v58 = vpop.f32.mrf.mxu1 }
 0x21b   :  { %v908_v13 = vperm.slane %v864_v58, 0  ;;  %v916_v16 = vperm.slane %v864_v58, 1  ;;  %v1467_v58 = vld [vmem:[%s4135_s6 + $0x90] sm:$0xff] }
 0x21d   :  { %v912_v15 = vmul.f32 %v908_v13, %v3666_v6 }
 0x21f   :  { %v920_v17 = vadd.f32 %v916_v16, %v912_v15 }
 0x220   :  { %v844_v18 = vpop.f32.mrf.mxu2 }
 0x221   :  { %v924_v19 = vpack.c.bf16 %v920_v17, %v920_v17  ;;  %v907_v20 = vperm.slane %v844_v18, 0  ;;  %v904_v21 = vpop.f32.mrf.mxu3  ;;  %v915_v24 = vperm.slane %v844_v18, 1  ;;  %v1465_v17 = vld [vmem:[%s4135_s6 + $0x80] sm:$0xff] }
 0x222   :  { %v910_v22 = vperm.slane %v904_v21, 0  ;;  %v918_v26 = vperm.slane %v904_v21, 1 }
 0x223   :  { %v911_v23 = vmul.f32 %v907_v20, %v3647_v53  ;;  %1332 = vmatmul.bf16.vlgmr.msra.gmra.mxu1 %v924_v19  ;;  %v1464_v53 = vld [vmem:[%s4135_s6 + $0x78] sm:$0xff] }
 0x224   :  { %v914_v25 = vmul.f32 %v910_v22, %v3721_v3  ;;  %v1463_v3 = vld [vmem:[%s4135_s6 + $0x70] sm:$0xff]  ;;  %1501 = vmatpush.msra.mxu1 %v1480_v43 }
 0x225   :  { %v919_v27 = vadd.f32 %v915_v24, %v911_v23 }
 0x226   :  { %v922_v28 = vadd.f32 %v918_v26, %v914_v25  ;;  %1502 = vmatpush.msra.mxu1 %v1479_v45 }
 0x227   :  { %v923_v29 = vpack.c.bf16 %v919_v27, %v919_v27 }
 0x228   :  { %v926_v30 = vpack.c.bf16 %v922_v28, %v922_v28  ;;  %v884_v6 = vpop.f32.mrf.mxu2  ;;  %1503 = vmatpush.msra.mxu1 %v1478_v48 }
 0x229   :  { %v909_v31 = vperm.slane %v884_v6, 0  ;;  %1319 = vmatmul.bf16.vlgmr.msrb.gmra.mxu0 %v923_v29  ;;  %v917_v33 = vperm.slane %v884_v6, 1 }
 0x22a   :  { %1358 = vmatmul.bf16.vlgmr.msra.gmra.mxu3 %v926_v30  ;;  %1481 = vmatpush.msrb.mxu0 %v1464_v53 }
 0x22b   :  { %v913_v32 = vmul.f32 %v909_v31, %v3714_v50  ;;  %v1462_v50 = vld [vmem:[%s4135_s6 + $0x68] sm:$0xff]  ;;  %1504 = vmatpush.msra.mxu1 %v1477_v51 }
 0x22c   :  { %1482 = vmatpush.msrb.mxu0 %v1463_v3 }
 0x22d   :  { %v921_v34 = vadd.f32 %v917_v33, %v913_v32  ;;  %1505 = vmatpush.msra.mxu1 %v1476_v54 }
 0x22e   :  { %1483 = vmatpush.msrb.mxu0 %v1462_v50 }
 0x22f   :  { %v925_v35 = vpack.c.bf16 %v921_v34, %v921_v34  ;;  %1506 = vmatpush.msra.mxu1 %v1475_v57 }
 0x230   :  { %1484 = vmatpush.msrb.mxu0 %v1461_v37 }
 0x231   :  { %1345 = vmatmul.bf16.vlgmr.msrb.gmra.mxu2 %v925_v35  ;;  %1507 = vmatpush.msra.mxu1 %v1474_v62 }
 0x232   :  { %1485 = vmatpush.msrb.mxu0 %v1460_v38 }
 0x233   :  { %1384 = vmatmul.bf16.vlgmr.msrb.gmra.mxu1 %v924_v19 }
 0x234   :  { %1486 = vmatpush.msrb.mxu0 %v1459_v39  ;;  %1508 = vmatpush.msra.mxu1 %v1473_v63 }
 0x236   :  { %1487 = vmatpush.msrb.mxu0 %v1458_v40  ;;  %1509 = vmatpush.msra.mxu1 %v1472_v0 }
 0x238   :  { %1488 = vmatpush.msrb.mxu0 %v1457_v41  ;;  %1510 = vmatpush.msra.mxu1 %v1471_v4 }
 0x239   :  { %1371 = vmatmul.bf16.vlgmr.msra.gmra.mxu0 %v923_v29 }
 0x23a   :  { %1410 = vmatmul.bf16.vlgmr.msrb.gmra.mxu3 %v926_v30  ;;  %1489 = vmatpush.msrb.mxu0 %v1456_v42 }
 0x23b   :  { %1511 = vmatpush.msra.mxu1 %v1470_v7  ;;  %v1554_v7 = vld [vmem:[%s4136_s7 + $0x18] sm:$0xff] }
 0x23c   :  { %1490 = vmatpush.msrb.mxu0 %v1455_v44  ;;  %1593 = vmatpush.msra.mxu3 %v1554_v7 }
 0x23d   :  { %1512 = vmatpush.msra.mxu1 %v1469_v8  ;;  %v1551_v8 = vld [vmem:[%s4136_s7] sm:$0xff] }
 0x23e   :  { %1491 = vmatpush.msrb.mxu0 %v1454_v47 }
 0x23f   :  { %1513 = vmatpush.msra.mxu1 %v1468_v9  ;;  %v1552_v9 = vld [vmem:[%s4136_s7 + $0x8] sm:$0xff] }
 0x240   :  { %1492 = vmatpush.msrb.mxu0 %v1453_v49  ;;  %1594 = vmatpush.msra.mxu3 %v1552_v9 }
 0x241   :  { %1397 = vmatmul.bf16.vlgmr.msra.gmra.mxu2 %v925_v35  ;;  %1514 = vmatpush.msra.mxu1 %v1467_v58  ;;  %v2920_v58 = vld [vmem:[%s4138_s9 + $0x78] sm:$0xff] }
 0x242   :  { %1493 = vmatpush.msrb.mxu0 %v1452_v52  ;;  %1750 = vmatpush.bf16.msrb.mxu3 %v2920_v58 }
 0x243   :  { %1515 = vmatpush.msra.mxu1 %v1466_v14  ;;  %v2910_v14 = vld [vmem:[%s4138_s9 + $0x28] sm:$0xff] }
 0x244   :  { %1494 = vmatpush.msrb.mxu0 %v1451_v56 }
 0x245   :  { %1516 = vmatpush.msra.mxu1 %v1465_v17 }
 0x246   :  { %1495 = vmatpush.msrb.mxu0 %v1450_v61 }
 0x248   :  { %1496 = vmatpush.msrb.mxu0 %v1449_v36 }
 0x2a0   :  { %v1333_v46 = vpop.f32.mrf.mxu1 }
 0x2a6   :  { %v1320_v55 = vpop.f32.mrf.mxu0 }
 0x2a7   :  { %v1334_v10 = vadd.f32 %v1333_v46, %v1320_v55 }
 0x2a8   :  { %v1335_v60 = vpop.f32.mrf.mxu1 }
 0x2ad   :  { %v1359_v1 = vpop.f32.mrf.mxu3 }
 0x2ae   :  { %v1322_v2 = vpop.f32.mrf.mxu0 }
 0x2b0   :  { %v1385_v5 = vpop.f32.mrf.mxu1 }
 0x2b4   :  { %v1346_v11 = vpop.f32.mrf.mxu2 }
 0x2b5   :  { %v1347_v59 = vadd.f32 %v1346_v11, %v1334_v10  ;;  %v1361_v12 = vpop.f32.mrf.mxu3  ;;  %v2912_v11 = vld [vmem:[%s4138_s9 + $0x38] sm:$0xff] }
 0x2b6   :  { %v1372_v13 = vpop.f32.mrf.mxu0  ;;  %v2911_v12 = vld [vmem:[%s4138_s9 + $0x30] sm:$0xff] }
 0x2b7   :  { %v1360_v15 = vadd.f32 %v1359_v1, %v1347_v59  ;;  %v1386_v31 = vadd.f32 %v1385_v5, %v1372_v13  ;;  %v1553_v5 = vld [vmem:[%s4136_s7 + $0x10] sm:$0xff] }
 0x2b8   :  { %v1387_v16 = vpop.f32.mrf.mxu1  ;;  %1573 = vmatpush.msrb.mxu2 %v1553_v5  ;;  %v2919_v13 = vld [vmem:[%s4138_s9 + $0x70] sm:$0xff]  ;;  %v1780_v5 = vld [vmem:[%s4139_s10] sm:$0xff] }
 0x2b9   :  { %v3859_v18 = vmax.f32 %v1360_v15, 0.0  ;;  %1751 = vmatpush.bf16.msrb.mxu3 %v2919_v13  ;;  %v2918_v15 = vld [vmem:[%s4138_s9 + $0x68] sm:$0xff] }
 0x2ba   :  { %1574 = vmatpush.msrb.mxu2 %v1551_v8 }
 0x2bb   :  { %v1417_v19 = vmul.f32 %v3859_v18, %v3859_v18  ;;  %v1419_v20 = vsel %vm583_vm0, %v3859_v18, 0.0 }
 0x2bc   :  { %v1420_v21 = vrot.slane %v1419_v20, 4  ;;  %v1348_v22 = vpop.f32.mrf.mxu2  ;;  %1737 = vmatpush.bf16.msra.mxu2 %v2912_v11 }
 0x2bd   :  { %v1433_v23 = vsel %vm583_vm0, %v1417_v19, 0.0  ;;  %v1411_v24 = vpop.f32.mrf.mxu3  ;;  %1752 = vmatpush.bf16.msrb.mxu3 %v2918_v15  ;;  %v2909_v19 = vld [vmem:[%s4138_s9 + $0x20] sm:$0xff] }
 0x2be   :  { %v1421_v25 = vadd.f32 %v1420_v21, %v1419_v20  ;;  %v1434_v26 = vrot.slane %v1433_v23, 4  ;;  %v1374_v27 = vpop.f32.mrf.mxu0  ;;  %v2917_v20 = vld [vmem:[%s4138_s9 + $0x60] sm:$0xff] }
 0x2bf   :  { %v2907_v27 = vld [vmem:[%s4138_s9 + $0x10] sm:$0xff] }
 0x2c0   :  { %v1422_v28 = vrot.slane %v1421_v25, 2  ;;  %v1435_v29 = vadd.f32 %v1434_v26, %v1433_v23  ;;  %1738 = vmatpush.bf16.msra.mxu2 %v2911_v12  ;;  %v2908_v23 = vld [vmem:[%s4138_s9 + $0x18] sm:$0xff] }
 0x2c1   :  { %1753 = vmatpush.bf16.msrb.mxu3 %v2917_v20 }
 0x2c2   :  { %v1423_v30 = vadd.f32 %v1422_v28, %v1421_v25  ;;  %v1436_v6 = vrot.slane %v1435_v29, 2  ;;  %v2915_v28 = vld [vmem:[%s4138_s9 + $0x50] sm:$0xff] }
 0x2c4   :  { %v1398_v32 = vpop.f32.mrf.mxu2  ;;  %v1424_v33 = vrot.slane %v1423_v30, 1  ;;  %v1437_v34 = vadd.f32 %v1436_v6, %v1435_v29  ;;  %1739 = vmatpush.bf16.msra.mxu2 %v2910_v14  ;;  %v1528_v29 = vld [vmem:[%s4137_s8] sm:$0x1] }
 0x2c5   :  { %v1399_v35 = vadd.f32 %v1398_v32, %v1386_v31  ;;  %v1413_v53 = vpop.f32.mrf.mxu3  ;;  %v1544_v32 = vld [vmem:[%s4137_s8 + $0x1] sm:$0x1] }
 0x2c6   :  { %v1438_v3 = vrot.slane %v1437_v34, 1  ;;  %v1425_v37 = vadd.f32 %v1424_v33, %v1423_v30 }
 0x2c7   :  { %v1412_v50 = vadd.f32 %v1411_v24, %v1399_v35  ;;  %v2916_v24 = vld [vmem:[%s4138_s9 + $0x58] sm:$0xff] }
 0x2c8   :  { %v1439_v38 = vadd.f32 %v1438_v3, %v1437_v34  ;;  %1740 = vmatpush.bf16.msra.mxu2 %v2909_v19  ;;  %1754 = vmatpush.bf16.msrb.mxu3 %v2916_v24  ;;  %v2906_v3 = vld [vmem:[%s4138_s9 + $0x8] sm:$0xff] }
 0x2c9   :  { %v3866_v39 = vmax.f32 %v1412_v50, 0.0  ;;  %v2914_v50 = vld [vmem:[%s4138_s9 + $0x48] sm:$0xff] }
 0x2ca   :  { %v1447_v40 = vsel %vm640_vm1, %v1425_v37, %v1439_v38  ;;  %v2905_v37 = vld [vmem:[%s4138_s9] sm:$0xff] }
 0x2cb   :  { %v1418_v41 = vmul.f32 %v3866_v39, %v3866_v39  ;;  %v1426_v42 = vsel %vm583_vm0, %v3866_v39, 0.0  ;;  %1497 = vmatmul.f32.vlgmr.msrb.gmra.mxu0 %v1447_v40  ;;  %v2913_v38 = vld [vmem:[%s4138_s9 + $0x40] sm:$0xff]  ;;  %v1795_v40 = vld [vmem:[%s4139_s10 + $0x78] sm:$0xff] }
 0x2cc   :  { %v1427_v43 = vrot.slane %v1426_v42, 4  ;;  %v1400_v44 = vpop.f32.mrf.mxu2  ;;  %1741 = vmatpush.bf16.msra.mxu2 %v2908_v23  ;;  %1755 = vmatpush.bf16.msrb.mxu3 %v2915_v28 }
 0x2cd   :  { %v1440_v45 = vsel %vm583_vm0, %v1418_v41, 0.0  ;;  %v1794_v41 = vld [vmem:[%s4139_s10 + $0x70] sm:$0xff]  ;;  %1796 = vmatpush.msra.mxu0 %v1795_v40  ;;  %v1791_v44 = vld [vmem:[%s4139_s10 + $0x58] sm:$0xff] }
 0x2ce   :  { %v1428_v46 = vadd.f32 %v1427_v43, %v1426_v42  ;;  %v1441_v47 = vrot.slane %v1440_v45, 4  ;;  %v1793_v42 = vld [vmem:[%s4139_s10 + $0x68] sm:$0xff]  ;;  %v1792_v43 = vld [vmem:[%s4139_s10 + $0x60] sm:$0xff] }
 0x2cf   :  { %1797 = vmatpush.msra.mxu0 %v1794_v41 }
 0x2d0   :  { %v1429_v48 = vrot.slane %v1428_v46, 2  ;;  %v1442_v49 = vadd.f32 %v1441_v47, %v1440_v45  ;;  %1742 = vmatpush.bf16.msra.mxu2 %v2907_v27  ;;  %1756 = vmatpush.bf16.msrb.mxu3 %v2914_v50 }
 0x2d1   :  { %1798 = vmatpush.msra.mxu0 %v1793_v42  ;;  %v2925_v42 = vld [vmem:[%s4142_s13 + $0x20] sm:$0xff] }
 0x2d2   :  { %v1430_v51 = vadd.f32 %v1429_v48, %v1428_v46  ;;  %v1443_v52 = vrot.slane %v1442_v49, 2 }
 0x2d3   :  { %1799 = vmatpush.msra.mxu0 %v1792_v43 }
 0x2d4   :  { %v1431_v54 = vrot.slane %v1430_v51, 1  ;;  %v1444_v55 = vadd.f32 %v1443_v52, %v1442_v49  ;;  %1743 = vmatpush.bf16.msra.mxu2 %v2906_v3  ;;  %1757 = vmatpush.bf16.msrb.mxu3 %v2913_v38  ;;  %v2928_v3 = vld [vmem:[%s4142_s13 + $0x38] sm:$0xff]  ;;  %v2926_v38 = vld [vmem:[%s4142_s13 + $0x28] sm:$0xff] }
 0x2d5   :  { %1800 = vmatpush.msra.mxu0 %v1791_v44 }
 0x2d6   :  { %v1445_v56 = vrot.slane %v1444_v55, 1  ;;  %v1432_v57 = vadd.f32 %v1431_v54, %v1430_v51 }
 0x2d8   :  { %v1446_v60 = vadd.f32 %v1445_v56, %v1444_v55  ;;  %1744 = vmatpush.bf16.msra.mxu2 %v2905_v37  ;;  %v2927_v37 = vld [vmem:[%s4142_s13 + $0x30] sm:$0xff] }
 0x2da   :  { %v1448_v61 = vsel %vm640_vm1, %v1432_v57, %v1446_v60 }
 0x2db   :  { %1517 = vmatmul.f32.vlgmr.msra.gmra.mxu1 %v1448_v61  ;;  %v1790_v61 = vld [vmem:[%s4139_s10 + $0x50] sm:$0xff] }
 0x2dc   :  { %1801 = vmatpush.msra.mxu0 %v1790_v61 }
 0x348   :  { %v1498_v62 = vpop.f32.mrf.mxu0 }
 0x358   :  { %v1518_v36 = vpop.f32.mrf.mxu1 }
 0x359   :  { %v1519_v63 = vadd.f32 %v1518_v36, %v1498_v62  ;;  %v1789_v62 = vld [vmem:[%s4139_s10 + $0x48] sm:$0xff]  ;;  %v1786_v36 = vld [vmem:[%s4139_s10 + $0x30] sm:$0xff] }
 0x35a   :  { %1802 = vmatpush.msra.mxu0 %v1789_v62  ;;  %v2922_v62 = vld [vmem:[%s4142_s13 + $0x8] sm:$0xff] }
 0x35b   :  { %v1521_v0 = vmul.f32 0.03125, %v1519_v63  ;;  %v1785_v63 = vld [vmem:[%s4139_s10 + $0x28] sm:$0xff] }
 0x35d   :  { %v1522_v1 = vmul.f32 %v1521_v0, %v1521_v0 }
 0x35f   :  { %v1524_v2 = vrot.slane %v1522_v1, 7  ;;  %v1783_v1 = vld [vmem:[%s4139_s10 + $0x18] sm:$0xff] }
 0x361   :  { %v1526_v4 = vsub.f32 %v1521_v0, %v1524_v2  ;;  %v1782_v2 = vld [vmem:[%s4139_s10 + $0x10] sm:$0xff] }
 0x363   :  { %v1527_v10 = vmax.f32 %v1526_v4, 0.0  ;;  %v1781_v4 = vld [vmem:[%s4139_s10 + $0x8] sm:$0xff] }
 0x365   :  { %v1529_v59 = vadd.f32 1e-05, %v1527_v10 }
 0x367   :  { %2941 = vrsqrt.f32 %v1529_v59  ;;  %vm1536_vm7 = vweird.f32 %v1529_v59 }
 0x36d   :  { %v2942_v16 = vpop.eup %2941 }
 0x36e   :  { %v1531_v17 = vmul.f32 %v2942_v16, %v1529_v59  ;;  %vm1537_vm6 = vweird.f32 %v2942_v16 }
 0x36f   :  { %vm1538_vm8 = vmor %vm1536_vm7, %vm1537_vm6 }
 0x370   :  { %v1532_v21 = vmul.f32 %v2942_v16, %v1531_v17 }
 0x372   :  { %v1533_v22 = vmul.f32 0.5, %v1532_v21 }
 0x374   :  { %v1534_v25 = vsub.f32 1.5, %v1533_v22 }
 0x376   :  { %v1535_v26 = vmul.f32 %v2942_v16, %v1534_v25 }
 0x378   :  { %v1539_v30 = vsel %vm1538_vm8, %v2942_v16, %v1535_v26 }
 0x379   :  { %v1541_v6 = vrot.slane %v1539_v30, 1 }
 0x37b   :  { %v1543_v31 = vmul.f32 %v1541_v6, %v1528_v29  ;;  %v1849_v6 = vld [vmem:[%s4140_s11 + $0x18] sm:$0xff] }
 0x37c   :  { %1866 = vmatpush.msrb.mxu1 %v1849_v6 }
 0x37d   :  { %v1545_v33 = vmul.f32 %v1543_v31, %v1521_v0  ;;  %v1784_v0 = vld [vmem:[%s4139_s10 + $0x20] sm:$0xff] }
 0x37f   :  { %v1546_v34 = vsub.f32 %v1544_v32, %v1545_v33  ;;  %v1848_v32 = vld [vmem:[%s4140_s11 + $0x10] sm:$0xff] }
 0x380   :  { %1867 = vmatpush.msrb.mxu1 %v1848_v32 }
 0x381   :  { %v1548_v35 = vrot.slane %v1546_v34, 7  ;;  %v1847_v34 = vld [vmem:[%s4140_s11 + $0x8] sm:$0xff] }
 0x382   :  { %1868 = vmatpush.msrb.mxu1 %v1847_v34 }
 0x383   :  { %v1550_v53 = vsel %vm640_vm1, %v1543_v31, %v1548_v35  ;;  %v1846_v35 = vld [vmem:[%s4140_s11] sm:$0xff] }
 0x384   :  { %2659 = vmatmul.msk.f32.vlgmr.msrb.gmra.mxu2 %vm1555_vm9, %v1550_v53  ;;  %2660 = vmatmul.msk.f32.vlgmr.msra.gmra.mxu3 %vm1555_vm9, %v1550_v53 }
 0x385   :  { %1869 = vmatpush.msrb.mxu1 %v1846_v35  ;;  %v2039_v35 = vld [vmem:[%s4144_s15 + $0x10] sm:$0xff] }
 0x387   :  { %1943 = vmatpush.bf16.msra.mxu1 %v2928_v3  ;;  %v2038_v3 = vld [vmem:[%s4144_s15 + $0x8] sm:$0xff] }
 0x38b   :  { %1944 = vmatpush.bf16.msra.mxu1 %v2927_v37 }
 0x38f   :  { %1945 = vmatpush.bf16.msra.mxu1 %v2926_v38  ;;  %v2932_v38 = vld [vmem:[%s4146_s17 + $0x18] sm:$0xff] }
 0x393   :  { %1946 = vmatpush.bf16.msra.mxu1 %v2925_v42 }
 0x407   :  { %v1576_v45 = vpop.f32.mrf.mxu2  ;;  %v1596_v46 = vpop.f32.mrf.mxu3 }
 0x408   :  { %v1599_v47 = vperm.slane %v1576_v45, 0  ;;  %v1600_v48 = vperm.slane %v1596_v46, 0  ;;  %v1603_v51 = vperm.slane %v1576_v45, 1  ;;  %v1604_v54 = vperm.slane %v1596_v46, 1  ;;  %v2924_v45 = vld [vmem:[%s4142_s13 + $0x18] sm:$0xff] }
 0x409   :  { %1947 = vmatpush.bf16.msra.mxu1 %v2924_v45 }
 0x40a   :  { %v1601_v49 = vmul.f32 %v1599_v47, %v3859_v18  ;;  %v1602_v52 = vmul.f32 %v1600_v48, %v3866_v39  ;;  %v1788_v18 = vld [vmem:[%s4139_s10 + $0x40] sm:$0xff]  ;;  %v1787_v39 = vld [vmem:[%s4139_s10 + $0x38] sm:$0xff]  ;;  %v2923_v48 = vld [vmem:[%s4142_s13 + $0x10] sm:$0xff] }
 0x40b   :  { %1803 = vmatpush.msra.mxu0 %v1788_v18  ;;  %v2921_v18 = vld [vmem:[%s4142_s13] sm:$0xff] }
 0x40c   :  { %v1605_v55 = vadd.f32 %v1603_v51, %v1601_v49  ;;  %v1606_v56 = vadd.f32 %v1604_v54, %v1602_v52  ;;  %v1823_v49 = vld [vmem:[%s4141_s12] sm:$0x1] }
 0x40d   :  { %1804 = vmatpush.msra.mxu0 %v1787_v39  ;;  %1948 = vmatpush.bf16.msra.mxu1 %v2923_v48  ;;  %v2014_v48 = vld [vmem:[%s4145_s16] sm:$0x1] }
 0x40e   :  { %v1607_v57 = vpack.c.bf16 %v1605_v55, %v1605_v55  ;;  %v1608_v60 = vpack.c.bf16 %v1606_v56, %v1606_v56  ;;  %v1839_v55 = vld [vmem:[%s4141_s12 + $0x1] sm:$0x1]  ;;  %s3002_s12 = smov 64  }
 0x40f   :  { %1805 = vmatpush.msra.mxu0 %v1786_v36 }
 0x410   :  { %1745 = vmatmul.bf16.vlgmr.msra.gmra.mxu2 %v1607_v57  ;;  %1758 = vmatmul.bf16.vlgmr.msrb.gmra.mxu3 %v1608_v60 }
 0x411   :  { %1806 = vmatpush.msra.mxu0 %v1785_v63  ;;  %1949 = vmatpush.bf16.msra.mxu1 %v2922_v62  ;;  %v2929_v62 = vld [vmem:[%s4146_s17] sm:$0xff] }
 0x413   :  { %1807 = vmatpush.msra.mxu0 %v1784_v0 }
 0x415   :  { %1808 = vmatpush.msra.mxu0 %v1783_v1  ;;  %1950 = vmatpush.bf16.msra.mxu1 %v2921_v18 }
 0x417   :  { %1809 = vmatpush.msra.mxu0 %v1782_v2 }
 0x419   :  { %1810 = vmatpush.msra.mxu0 %v1781_v4 }
 0x41b   :  { %1811 = vmatpush.msra.mxu0 %v1780_v5 }
 0x41d   :  { %2116 = vmatpush.bf16.msrb.mxu0 %v2932_v38 }
 0x493   :  { %v1746_v7 = vpop.f32.mrf.mxu2  ;;  %v1759_v8 = vpop.f32.mrf.mxu3 }
 0x494   :  { %v1760_v9 = vadd.f32 %v1759_v8, %v1746_v7 }
 0x496   :  { %v3992_v10 = vmax.f32 %v1760_v9, 0.0  ;;  %v1983_v9 = vld [vmem:[%s4143_s14 + $0x38] sm:$0xff] }
 0x497   :  { %1995 = vmatpush.msrb.mxu2 %v1983_v9 }
 0x498   :  { %v1764_v11 = vmul.f32 %v3992_v10, %v3992_v10  ;;  %v1765_v58 = vsel %vm583_vm0, %v3992_v10, 0.0 }
 0x499   :  { %v1766_v59 = vrot.slane %v1765_v58, 4 }
 0x49a   :  { %v1772_v12 = vsel %vm583_vm0, %v1764_v11, 0.0  ;;  %v1981_v11 = vld [vmem:[%s4143_s14 + $0x28] sm:$0xff] }
 0x49b   :  { %v1767_v13 = vadd.f32 %v1766_v59, %v1765_v58  ;;  %v1773_v14 = vrot.slane %v1772_v12, 4  ;;  %v1748_v15 = vpop.f32.mrf.mxu2  ;;  %v1761_v16 = vpop.f32.mrf.mxu3  ;;  %v1980_v58 = vld [vmem:[%s4143_s14 + $0x20] sm:$0xff]  ;;  %v1979_v59 = vld [vmem:[%s4143_s14 + $0x18] sm:$0xff] }
 0x49d   :  { %v1768_v17 = vrot.slane %v1767_v13, 2  ;;  %v1774_v19 = vadd.f32 %v1773_v14, %v1772_v12  ;;  %v1978_v12 = vld [vmem:[%s4143_s14 + $0x10] sm:$0xff]  ;;  %v1976_v14 = vld [vmem:[%s4143_s14] sm:$0xff] }
 0x49f   :  { %v1769_v20 = vadd.f32 %v1768_v17, %v1767_v13  ;;  %v1775_v21 = vrot.slane %v1774_v19, 2  ;;  %v1977_v13 = vld [vmem:[%s4143_s14 + $0x8] sm:$0xff] }
 0x4a1   :  { %v1770_v22 = vrot.slane %v1769_v20, 1  ;;  %v1776_v23 = vadd.f32 %v1775_v21, %v1774_v19 }
 0x4a3   :  { %v1777_v24 = vrot.slane %v1776_v23, 1  ;;  %v1771_v25 = vadd.f32 %v1770_v22, %v1769_v20 }
 0x4a5   :  { %v1778_v26 = vadd.f32 %v1777_v24, %v1776_v23 }
 0x4a7   :  { %v1779_v27 = vsel %vm640_vm1, %v1771_v25, %v1778_v26 }
 0x4a8   :  { %1812 = vmatmul.f32.vlgmr.msra.gmra.mxu0 %v1779_v27  ;;  %v2044_v27 = vld [vmem:[%s4144_s15 + $0x38] sm:$0xff] }
 0x4a9   :  { %2056 = vmatpush.msra.mxu3 %v2044_v27 }
 0x525   :  { %v1813_v28 = vpop.f32.mrf.mxu0 }
 0x526   :  { %v1816_v29 = vmul.f32 0.125, %v1813_v28  ;;  %v2043_v28 = vld [vmem:[%s4144_s15 + $0x30] sm:$0xff] }
 0x527   :  { %2057 = vmatpush.msra.mxu3 %v2043_v28 }
 0x528   :  { %v1817_v30 = vmul.f32 %v1816_v29, %v1816_v29 }
 0x52a   :  { %v1819_v31 = vrot.slane %v1817_v30, 7 }
 0x52c   :  { %v1821_v33 = vsub.f32 %v1816_v29, %v1819_v31  ;;  %v2041_v31 = vld [vmem:[%s4144_s15 + $0x20] sm:$0xff] }
 0x52e   :  { %v1822_v53 = vmax.f32 %v1821_v33, 0.0  ;;  %v2040_v33 = vld [vmem:[%s4144_s15 + $0x18] sm:$0xff] }
 0x530   :  { %v1824_v50 = vadd.f32 1e-05, %v1822_v53 }
 0x532   :  { %2943 = vrsqrt.f32 %v1824_v50  ;;  %vm1831_vm11 = vweird.f32 %v1824_v50 }
 0x538   :  { %v2944_v40 = vpop.eup %2943 }
 0x539   :  { %v1826_v41 = vmul.f32 %v2944_v40, %v1824_v50  ;;  %vm1832_vm10 = vweird.f32 %v2944_v40  ;;  %v2037_v50 = vld [vmem:[%s4144_s15] sm:$0xff] }
 0x53a   :  { %vm1833_vm12 = vmor %vm1831_vm11, %vm1832_vm10 }
 0x53b   :  { %v1827_v43 = vmul.f32 %v2944_v40, %v1826_v41  ;;  %v2931_v41 = vld [vmem:[%s4146_s17 + $0x10] sm:$0xff] }
 0x53c   :  { %2117 = vmatpush.bf16.msrb.mxu0 %v2931_v41 }
 0x53d   :  { %v1828_v44 = vmul.f32 0.5, %v1827_v43 }
 0x53f   :  { %v1829_v46 = vsub.f32 1.5, %v1828_v44 }
 0x541   :  { %v1830_v47 = vmul.f32 %v2944_v40, %v1829_v46 }
 0x543   :  { %v1834_v51 = vsel %vm1833_vm12, %v2944_v40, %v1830_v47 }
 0x544   :  { %v1836_v52 = vrot.slane %v1834_v51, 1 }
 0x546   :  { %v1838_v54 = vmul.f32 %v1836_v52, %v1823_v49 }
 0x548   :  { %v1840_v56 = vmul.f32 %v1838_v54, %v1816_v29  ;;  %v2042_v29 = vld [vmem:[%s4144_s15 + $0x28] sm:$0xff] }
 0x549   :  { %2058 = vmatpush.msra.mxu3 %v2042_v29 }
 0x54a   :  { %v1841_v57 = vsub.f32 %v1839_v55, %v1840_v56 }
 0x54b   :  { %2059 = vmatpush.msra.mxu3 %v2041_v31 }
 0x54c   :  { %v1843_v60 = vrot.slane %v1841_v57, 7 }
 0x54d   :  { %2060 = vmatpush.msra.mxu3 %v2040_v33 }
 0x54e   :  { %v1845_v61 = vsel %vm640_vm1, %v1838_v54, %v1843_v60  ;;  %v2030_v54 = vld [vmem:[%s4145_s16 + $0x1] sm:$0x1] }
 0x54f   :  { %2725 = vmatmul.msk.f32.vlgmr.msrb.gmra.mxu1 %vm1850_vm13, %v1845_v61  ;;  %2061 = vmatpush.msra.mxu3 %v2039_v35  ;;  %v2930_v61 = vld [vmem:[%s4146_s17 + $0x8] sm:$0xff]  ;;  %s2133_s17 = sshll.u32 %s4148_s19, 4  ;;  %s2134_s17 = int_to_ptr.hbm [resolvable:$true] %s2133_s17 }
 0x550   :  { %2118 = vmatpush.bf16.msrb.mxu0 %v2930_v61 }
 0x551   :  { %2062 = vmatpush.msra.mxu3 %v2038_v3 }
 0x553   :  { %2063 = vmatpush.msra.mxu3 %v2037_v50 }
 0x554   :  { %2119 = vmatpush.bf16.msrb.mxu0 %v2929_v62 }
 0x5cc   :  { %v1871_v39 = vpop.f32.mrf.mxu1 }
 0x5cd   :  { %v1874_v36 = vperm.slane %v1871_v39, 0  ;;  %v1876_v0 = vperm.slane %v1871_v39, 1 }
 0x5cf   :  { %v1875_v63 = vmul.f32 %v1874_v36, %v3992_v10  ;;  %v1982_v10 = vld [vmem:[%s4143_s14 + $0x30] sm:$0xff] }
 0x5d0   :  { %1996 = vmatpush.msrb.mxu2 %v1982_v10 }
 0x5d1   :  { %v1877_v1 = vadd.f32 %v1876_v0, %v1875_v63 }
 0x5d2   :  { %1997 = vmatpush.msrb.mxu2 %v1981_v11 }
 0x5d3   :  { %v1878_v2 = vpack.c.bf16 %v1877_v1, %v1877_v1 }
 0x5d4   :  { %1998 = vmatpush.msrb.mxu2 %v1980_v58 }
 0x5d5   :  { %1951 = vmatmul.bf16.vlgmr.msra.gmra.mxu1 %v1878_v2  ;;  %v2938_v2 = vld [vmem:[%s4147_s18] ss:$0 sm:$0xff] }
 0x5d6   :  { %1999 = vmatpush.msrb.mxu2 %v1979_v59 }
 0x5d8   :  { %2000 = vmatpush.msrb.mxu2 %v1978_v12 }
 0x5da   :  { %2001 = vmatpush.msrb.mxu2 %v1977_v13 }
 0x5dc   :  { %2002 = vmatpush.msrb.mxu2 %v1976_v14 }
 0x652   :  { %v1952_v4 = vpop.f32.mrf.mxu1 }
 0x653   :  { %v4044_v5 = vmax.f32 %v1952_v4, 0.0 }
 0x655   :  { %v1957_v7 = vmul.f32 %v4044_v5, %v4044_v5 }
 0x657   :  { %1959 = vrot.lane.b32.xlu0 %v1957_v7, %s3002_s12 }
 0x65a   :  { %v1954_v8 = vpop.f32.mrf.mxu1 }
 0x6c9   :  { %v1960_v15 = vpop.permute.xlu0 %1959 }
 0x6ca   :  { %v1963_v16 = vsel %vm1962_vm14, %v4044_v5, %v1960_v15 }
 0x6cb   :  { %v1964_v17 = vsel %vm583_vm0, %v1963_v16, 0.0 }
 0x6cc   :  { %v1965_v19 = vrot.slane %v1964_v17, 4 }
 0x6ce   :  { %v1966_v20 = vadd.f32 %v1965_v19, %v1964_v17 }
 0x6d0   :  { %v1967_v21 = vrot.slane %v1966_v20, 2 }
 0x6d2   :  { %v1968_v22 = vadd.f32 %v1967_v21, %v1966_v20 }
 0x6d4   :  { %v1969_v23 = vrot.slane %v1968_v22, 1 }
 0x6d6   :  { %v1970_v24 = vadd.f32 %v1969_v23, %v1968_v22 }
 0x6d8   :  { %1972 = vrot.lane.b32.xlu0 %v1970_v24, %s3002_s12 }
 0x74a   :  { %v1973_v25 = vpop.permute.xlu0 %1972 }
 0x74b   :  { %v1975_v26 = vsel %vm640_vm1, %v1970_v24, %v1973_v25 }
 0x74c   :  { %2758 = vmatmul.msk.f32.vlgmr.msrb.gmra.mxu2 %vm1962_vm14, %v1975_v26 }
 0x7cf   :  { %v2004_v30 = vpop.f32.mrf.mxu2 }
 0x7d0   :  { %v2007_v6 = vmul.f32 0.5, %v2004_v30 }
 0x7d2   :  { %v2008_v32 = vmul.f32 %v2007_v6, %v2007_v6 }
 0x7d4   :  { %v2010_v34 = vrot.slane %v2008_v32, 7 }
 0x7d6   :  { %v2012_v53 = vsub.f32 %v2007_v6, %v2010_v34 }
 0x7d8   :  { %v2013_v37 = vmax.f32 %v2012_v53, 0.0 }
 0x7da   :  { %v2015_v40 = vadd.f32 1e-05, %v2013_v37 }
 0x7dc   :  { %2945 = vrsqrt.f32 %v2015_v40  ;;  %vm2022_vm0 = vweird.f32 %v2015_v40 }
 0x7e2   :  { %v2946_v42 = vpop.eup %2945 }
 0x7e3   :  { %v2017_v43 = vmul.f32 %v2946_v42, %v2015_v40  ;;  %vm2023_vm15 = vweird.f32 %v2946_v42 }
 0x7e4   :  { %vm2024_vm2 = vmor %vm2022_vm0, %vm2023_vm15 }
 0x7e5   :  { %v2018_v44 = vmul.f32 %v2946_v42, %v2017_v43 }
 0x7e7   :  { %v2019_v45 = vmul.f32 0.5, %v2018_v44 }
 0x7e9   :  { %v2020_v46 = vsub.f32 1.5, %v2019_v45 }
 0x7eb   :  { %v2021_v47 = vmul.f32 %v2946_v42, %v2020_v46 }
 0x7ed   :  { %v2025_v49 = vsel %vm2024_vm2, %v2946_v42, %v2021_v47 }
 0x7ee   :  { %v2027_v51 = vrot.slane %v2025_v49, 1 }
 0x7f0   :  { %v2029_v52 = vmul.f32 %v2027_v51, %v2014_v48 }
 0x7f2   :  { %v2031_v55 = vmul.f32 %v2029_v52, %v2007_v6 }
 0x7f4   :  { %v2032_v56 = vsub.f32 %v2030_v54, %v2031_v55 }
 0x7f6   :  { %v2034_v57 = vrot.slane %v2032_v56, 7 }
 0x7f8   :  { %v2036_v60 = vsel %vm640_vm1, %v2029_v52, %v2034_v57 }
 0x7f9   :  { %2759 = vmatmul.msk.f32.vlgmr.msra.gmra.mxu3 %vm1962_vm14, %v2036_v60 }
 0x87c   :  { %v2065_v18 = vpop.f32.mrf.mxu3 }
 0x87d   :  { %v2068_v39 = vperm.slane %v2065_v18, 0  ;;  %v2070_v63 = vperm.slane %v2065_v18, 1 }
 0x87f   :  { %v2069_v36 = vmul.f32 %v2068_v39, %v4044_v5 }
 0x881   :  { %v2071_v0 = vadd.f32 %v2070_v63, %v2069_v36 }
 0x883   :  { %v2072_v1 = vpack.c.bf16 %v2071_v0, %v2071_v0 }
 0x885   :  { %2776 = vmatmul.msk.bf16.vlgmr.msrb.gmra.mxu0 %vm1962_vm14, %v2072_v1 }
 0x902   :  { %v2121_v4 = vpop.f32.mrf.mxu0 }
 0x903   :  { %v2122_v7 = vadd.f32 %v2938_v2, %v2121_v4 }
 0x905   :  { %2125 = vst [vmem:[#allocation5] sm:$0x3] %v2122_v7 }
 0x906   :  { %2136 = dma.vmem_to_hbm [thread:$0]  %s2132_s24, 32, %s2134_s17, [#allocation4]  }
 0x90a   :  { %v2123_v5 = vpop.f32.mrf.mxu0 }
 0x90b   :  { %2997 = dma.done.wait [#allocation4], 32  }
 0x90c   :  { %2998 = vsyncadd [#allocation4], 4294967264 }
 0x90d   :  { %2141 = vsyncpa [#allocation3], 1 }
 0x90e   :  { %2142 = vsyncpa [#allocation4], 1 }

</bundles_post_ra>
